<compile_context>
chip_gen: v5e
topology: v5e:2x2
jax: 0.10.0
libtpu: 0.0.40
codegen_flags: <defaults>
</compile_context>

<pallas_src>
import jax
import jax.numpy as jnp
from jax.experimental import pallas as pl
from jax.experimental.pallas import tpu as pltpu

# ----- model dimensions (small, consistent with the module's forward) -------
T = 8            # sequence length ("T+1" in the docstring)
B = 8            # batch
OBS_DIM = 16     # obs_dim (vector obs -> FeatureExtractor path)
ACT_DIM = 4      # action_dim
ACT_EMB = 16     # action_embedding_size
STATE_EMB = 32   # state_embedding_size
HIDDEN = 32      # rnn_hidden_size, rnn_num_layers = 1
P1, P2 = 32, 32  # policy_layers
RNN_IN = ACT_EMB + STATE_EMB
JOINT = HIDDEN + STATE_EMB

PARAM_ORDER = ["wa", "ba", "wobs", "bobs", "wih", "whh",
               "w1", "b1", "w2", "b2", "wo", "bo"]


def actor_rnn_kernel(
    prev_a_ref, obs_ref,                       # sequences, flattened (T*B, D)
    wa_ref, ba_ref,                            # action encoder
    wobs_ref, bobs_ref,                        # packed [state | current_state] encoder
    wih_ref, whh_ref,                          # packed GRU gate weights (., 3H)
    w1_ref, b1_ref, w2_ref, b2_ref,            # policy hidden layers
    wo_ref, bo_ref,                            # policy output layer (tanh)
    out_ref,                                   # new actions, (T*B, ACT_DIM)
    hs_scratch,                                # GRU hidden states, (T*B, H) f32 VMEM
):
    f32 = jnp.float32
    a = prev_a_ref[...]            # (T*B, ACT_DIM)
    o = obs_ref[...]               # (T*B, OBS_DIM)

    # ------- hoisted, batched over all T*B rows (h-independent) -------------
    # FeatureExtractor = Linear + relu
    ea = jnp.maximum(
        jnp.dot(a, wa_ref[...], preferred_element_type=f32) + ba_ref[...], 0.0)
    e_obs = jnp.maximum(
        jnp.dot(o, wobs_ref[...], preferred_element_type=f32) + bobs_ref[...], 0.0)
    es = e_obs[:, :STATE_EMB]      # RNN-path state embedding
    ec = e_obs[:, STATE_EMB:]      # current-state embedding (policy path)

    # Input-path GRU gate pre-activations for every timestep at once.
    # gi = concat(ea, es) @ W_ih -- split-matmul avoids an in-kernel concat.
    gi_all = (jnp.dot(ea, wih_ref[:ACT_EMB, :], preferred_element_type=f32)
              + jnp.dot(es, wih_ref[ACT_EMB:, :], preferred_element_type=f32))

    # ------- serial GRU recurrence: only h @ W_hh + nonlinearities ----------
    whh = whh_ref[...]             # (HIDDEN, 3H), kept in vregs across the loop
    h = jnp.zeros((B, HIDDEN), f32)
    for t in range(T):             # static unroll; T is small
        gi = gi_all[t * B:(t + 1) * B, :]                    # (B, 3H)
        gh = jnp.dot(h, whh, preferred_element_type=f32)     # (B, 3H)
        rz = jax.nn.sigmoid(gi[:, :2 * HIDDEN] + gh[:, :2 * HIDDEN])
        r = rz[:, :HIDDEN]
        z = rz[:, HIDDEN:]
        n = jnp.tanh(gi[:, 2 * HIDDEN:] + r * gh[:, 2 * HIDDEN:])
        h = (1.0 - z) * n + z * h
        hs_scratch[t * B:(t + 1) * B, :] = h

    # ------- policy head, batched over all T*B rows --------------------------
    hs = hs_scratch[...]           # (T*B, HIDDEN)
    # joint_embeds = concat(hidden_states, curr_embed); split-matmul again.
    p = (jnp.dot(hs, w1_ref[:HIDDEN, :], preferred_element_type=f32)
         + jnp.dot(ec, w1_ref[HIDDEN:, :], preferred_element_type=f32)
         + b1_ref[...])
    p = jnp.maximum(p, 0.0)
    p = jnp.maximum(
        jnp.dot(p, w2_ref[...], preferred_element_type=f32) + b2_ref[...], 0.0)
    out_ref[...] = jnp.tanh(
        jnp.dot(p, wo_ref[...], preferred_element_type=f32) + bo_ref[...])


def make_params(key):
    """Deterministic synthetic parameters (shapes from Actor_RNN.__init__),
    packed host-side for the kernel."""
    def lin(k, fan_in, fan_out):
        kw, kb = jax.random.split(k)
        scale = 1.0 / jnp.sqrt(jnp.float32(fan_in))
        w = jax.random.uniform(kw, (fan_in, fan_out), jnp.float32, -scale, scale)
        b = jax.random.uniform(kb, (1, fan_out), jnp.float32, -scale, scale)
        return w, b

    keys = jax.random.split(key, 12)
    wa, ba = lin(keys[0], ACT_DIM, ACT_EMB)
    ws, bs = lin(keys[1], OBS_DIM, STATE_EMB)
    wc, bc = lin(keys[2], OBS_DIM, STATE_EMB)
    # GRU weights ("orthogonal"-ish: plain scaled normals, deterministic).
    gscale = 1.0 / jnp.sqrt(jnp.float32(HIDDEN))
    wir = gscale * jax.random.normal(keys[3], (RNN_IN, HIDDEN), jnp.float32)
    wiz = gscale * jax.random.normal(keys[4], (RNN_IN, HIDDEN), jnp.float32)
    win = gscale * jax.random.normal(keys[5], (RNN_IN, HIDDEN), jnp.float32)
    whr = gscale * jax.random.normal(keys[6], (HIDDEN, HIDDEN), jnp.float32)
    whz = gscale * jax.random.normal(keys[7], (HIDDEN, HIDDEN), jnp.float32)
    whn = gscale * jax.random.normal(keys[8], (HIDDEN, HIDDEN), jnp.float32)
    # GRU biases: nn.init.constant_(param, 0) -> folded out of the kernel.
    w1, b1 = lin(keys[9], JOINT, P1)
    w2, b2 = lin(keys[10], P1, P2)
    wo, bo = lin(keys[11], P2, ACT_DIM)

    return {
        "wa": wa, "ba": ba,
        # both obs encoders packed into one matmul: [state_enc | current_enc]
        "wobs": jnp.concatenate([ws, wc], axis=1),          # (OBS_DIM, 2*STATE_EMB)
        "bobs": jnp.concatenate([bs, bc], axis=1),          # (1, 2*STATE_EMB)
        # GRU gate weights packed along lanes as [r | z | n]
        "wih": jnp.concatenate([wir, wiz, win], axis=1),    # (RNN_IN, 3H)
        "whh": jnp.concatenate([whr, whz, whn], axis=1),    # (HIDDEN, 3H)
        "w1": w1, "b1": b1, "w2": w2, "b2": b2, "wo": wo, "bo": bo,
    }


def actor_rnn_forward(prev_actions, observs, params):
    """Pallas forward: returns (new_actions, None) like Actor_RNN.forward (td3)."""
    assert prev_actions.ndim == observs.ndim == 3
    assert prev_actions.shape[0] == observs.shape[0]
    assert prev_actions.shape == (T, B, ACT_DIM)
    assert observs.shape == (T, B, OBS_DIM)

    # Flatten time into the sublane (row) axis outside the kernel: all
    # h-independent work becomes (T*B, .) matmuls, and the output is one slab.
    a2d = prev_actions.reshape(T * B, ACT_DIM)
    o2d = observs.reshape(T * B, OBS_DIM)

    out_flat = pl.pallas_call(
        actor_rnn_kernel,
        out_shape=jax.ShapeDtypeStruct((T * B, ACT_DIM), jnp.float32),
        # no grid: single invocation, all operands live whole in VMEM (~30 KB)
        scratch_shapes=[pltpu.VMEM((T * B, HIDDEN), jnp.float32)],
    )(a2d, o2d, *[params[name] for name in PARAM_ORDER])

    return out_flat.reshape(T, B, ACT_DIM), None


def actor_rnn_reference(prev_actions, observs, p):
    """Pure-JAX reference for numerical check (uses the packed params)."""
    relu = jax.nn.relu
    ea = relu(prev_actions @ p["wa"] + p["ba"])
    e_obs = relu(observs @ p["wobs"] + p["bobs"])
    es = e_obs[..., :STATE_EMB]
    ec = e_obs[..., STATE_EMB:]
    x = jnp.concatenate([ea, es], axis=-1)          # (T, B, RNN_IN)

    def gru_step(h, xt):
        gi = xt @ p["wih"]
        gh = h @ p["whh"]
        r = jax.nn.sigmoid(gi[:, :HIDDEN] + gh[:, :HIDDEN])
        z = jax.nn.sigmoid(gi[:, HIDDEN:2 * HIDDEN] + gh[:, HIDDEN:2 * HIDDEN])
        n = jnp.tanh(gi[:, 2 * HIDDEN:] + r * gh[:, 2 * HIDDEN:])
        h = (1.0 - z) * n + z * h
        return h, h

    _, hs = jax.lax.scan(gru_step, jnp.zeros((B, HIDDEN), jnp.float32), x)
    joint = jnp.concatenate([hs, ec], axis=-1)
    q = relu(joint @ p["w1"] + p["b1"])
    q = relu(q @ p["w2"] + p["b2"])
    return jnp.tanh(q @ p["wo"] + p["bo"])


if __name__ == "__main__":
    key = jax.random.PRNGKey(0)
    k_par, k_a, k_o = jax.random.split(key, 3)
    params = make_params(k_par)

    prev_actions = jax.random.normal(k_a, (T, B, ACT_DIM), jnp.float32)
    observs = jax.random.normal(k_o, (T, B, OBS_DIM), jnp.float32)

    new_actions, _ = actor_rnn_forward(prev_actions, observs, params)
    new_actions = jax.block_until_ready(new_actions)

    ref = jax.block_until_ready(actor_rnn_reference(prev_actions, observs, params))
    assert new_actions.shape == (T, B, ACT_DIM)
    assert jnp.allclose(new_actions, ref, atol=2e-3, rtol=2e-3), (
        float(jnp.max(jnp.abs(new_actions - ref))))

    print("KERNEL_OK")
</pallas_src>

<mosaic_0001>
module attributes {stable_mosaic.version = 11 : i64} {
  func.func @actor_rnn_kernel(%arg0: memref<64x4xf32, #tpu.memory_space<vmem>>, %arg1: memref<64x16xf32, #tpu.memory_space<vmem>>, %arg2: memref<4x16xf32, #tpu.memory_space<vmem>>, %arg3: memref<1x16xf32, #tpu.memory_space<vmem>>, %arg4: memref<16x64xf32, #tpu.memory_space<vmem>>, %arg5: memref<1x64xf32, #tpu.memory_space<vmem>>, %arg6: memref<48x96xf32, #tpu.memory_space<vmem>>, %arg7: memref<32x96xf32, #tpu.memory_space<vmem>>, %arg8: memref<64x32xf32, #tpu.memory_space<vmem>>, %arg9: memref<1x32xf32, #tpu.memory_space<vmem>>, %arg10: memref<32x32xf32, #tpu.memory_space<vmem>>, %arg11: memref<1x32xf32, #tpu.memory_space<vmem>>, %arg12: memref<32x4xf32, #tpu.memory_space<vmem>>, %arg13: memref<1x4xf32, #tpu.memory_space<vmem>>, %arg14: memref<64x4xf32, #tpu.memory_space<vmem>>, %arg15: memref<64x32xf32, #tpu.memory_space<vmem>>) attributes {dimension_semantics = [], scalar_prefetch = 0 : i64, scratch_operands = 1 : i64, tpu.core_type = #tpu.core_type<tc>} {
    %c0 = arith.constant 0 : index
    %c0_0 = arith.constant 0 : index
    %0 = vector.load %arg0[%c0, %c0_0] : memref<64x4xf32, #tpu.memory_space<vmem>>, vector<64x4xf32>
    %c0_1 = arith.constant 0 : index
    %c0_2 = arith.constant 0 : index
    %1 = vector.load %arg1[%c0_1, %c0_2] : memref<64x16xf32, #tpu.memory_space<vmem>>, vector<64x16xf32>
    %c0_3 = arith.constant 0 : index
    %c0_4 = arith.constant 0 : index
    %2 = vector.load %arg2[%c0_3, %c0_4] : memref<4x16xf32, #tpu.memory_space<vmem>>, vector<4x16xf32>
    %cst = arith.constant dense<0.000000e+00> : vector<64x16xf32>
    %3 = tpu.matmul %0, %2, %cst {dimension_numbers = #tpu.dot_dimension_numbers<[1], [0], [0], [1], [0, 0, 1, 1], [], []>} : vector<64x4xf32>, vector<4x16xf32>, vector<64x16xf32> -> vector<64x16xf32>
    %c0_5 = arith.constant 0 : index
    %c0_6 = arith.constant 0 : index
    %4 = vector.load %arg3[%c0_5, %c0_6] : memref<1x16xf32, #tpu.memory_space<vmem>>, vector<1x16xf32>
    %5 = vector.broadcast %4 : vector<1x16xf32> to vector<64x16xf32>
    %6 = arith.addf %3, %5 : vector<64x16xf32>
    %cst_7 = arith.constant 0.000000e+00 : f32
    %7 = vector.broadcast %cst_7 : f32 to vector<64x16xf32>
    %8 = arith.maximumf %6, %7 : vector<64x16xf32>
    %c0_8 = arith.constant 0 : index
    %c0_9 = arith.constant 0 : index
    %9 = vector.load %arg4[%c0_8, %c0_9] : memref<16x64xf32, #tpu.memory_space<vmem>>, vector<16x64xf32>
    %cst_10 = arith.constant dense<0.000000e+00> : vector<64x64xf32>
    %10 = tpu.matmul %1, %9, %cst_10 {dimension_numbers = #tpu.dot_dimension_numbers<[1], [0], [0], [1], [0, 0, 1, 1], [], []>} : vector<64x16xf32>, vector<16x64xf32>, vector<64x64xf32> -> vector<64x64xf32>
    %c0_11 = arith.constant 0 : index
    %c0_12 = arith.constant 0 : index
    %11 = vector.load %arg5[%c0_11, %c0_12] : memref<1x64xf32, #tpu.memory_space<vmem>>, vector<1x64xf32>
    %12 = vector.broadcast %11 : vector<1x64xf32> to vector<64x64xf32>
    %13 = arith.addf %10, %12 : vector<64x64xf32>
    %cst_13 = arith.constant 0.000000e+00 : f32
    %14 = vector.broadcast %cst_13 : f32 to vector<64x64xf32>
    %15 = arith.maximumf %13, %14 : vector<64x64xf32>
    %16 = vector.extract_strided_slice %15 {offsets = [0, 0], sizes = [64, 32], strides = [1, 1]} : vector<64x64xf32> to vector<64x32xf32>
    %17 = vector.extract_strided_slice %15 {offsets = [0, 32], sizes = [64, 32], strides = [1, 1]} : vector<64x64xf32> to vector<64x32xf32>
    %c0_14 = arith.constant 0 : index
    %c0_15 = arith.constant 0 : index
    %18 = vector.load %arg6[%c0_14, %c0_15] : memref<48x96xf32, #tpu.memory_space<vmem>>, vector<16x96xf32>
    %cst_16 = arith.constant dense<0.000000e+00> : vector<64x96xf32>
    %19 = tpu.matmul %8, %18, %cst_16 {dimension_numbers = #tpu.dot_dimension_numbers<[1], [0], [0], [1], [0, 0, 1, 1], [], []>} : vector<64x16xf32>, vector<16x96xf32>, vector<64x96xf32> -> vector<64x96xf32>
    %c16 = arith.constant 16 : index
    %c0_17 = arith.constant 0 : index
    %20 = vector.load %arg6[%c16, %c0_17] : memref<48x96xf32, #tpu.memory_space<vmem>>, vector<32x96xf32>
    %cst_18 = arith.constant dense<0.000000e+00> : vector<64x96xf32>
    %21 = tpu.matmul %16, %20, %cst_18 {dimension_numbers = #tpu.dot_dimension_numbers<[1], [0], [0], [1], [0, 0, 1, 1], [], []>} : vector<64x32xf32>, vector<32x96xf32>, vector<64x96xf32> -> vector<64x96xf32>
    %22 = arith.addf %19, %21 : vector<64x96xf32>
    %c0_19 = arith.constant 0 : index
    %c0_20 = arith.constant 0 : index
    %23 = vector.load %arg7[%c0_19, %c0_20] : memref<32x96xf32, #tpu.memory_space<vmem>>, vector<32x96xf32>
    %cst_21 = arith.constant 0.000000e+00 : f32
    %24 = vector.broadcast %cst_21 : f32 to vector<8x32xf32>
    %25 = vector.extract_strided_slice %22 {offsets = [0, 0], sizes = [8, 96], strides = [1, 1]} : vector<64x96xf32> to vector<8x96xf32>
    %cst_22 = arith.constant dense<0.000000e+00> : vector<8x96xf32>
    %26 = tpu.matmul %24, %23, %cst_22 {dimension_numbers = #tpu.dot_dimension_numbers<[1], [0], [0], [1], [0, 0, 1, 1], [], []>} : vector<8x32xf32>, vector<32x96xf32>, vector<8x96xf32> -> vector<8x96xf32>
    %27 = vector.extract_strided_slice %25 {offsets = [0, 0], sizes = [8, 64], strides = [1, 1]} : vector<8x96xf32> to vector<8x64xf32>
    %28 = vector.extract_strided_slice %26 {offsets = [0, 0], sizes = [8, 64], strides = [1, 1]} : vector<8x96xf32> to vector<8x64xf32>
    %29 = arith.addf %27, %28 : vector<8x64xf32>
    %30 = arith.negf %29 : vector<8x64xf32>
    %31 = math.exp %30 : vector<8x64xf32>
    %cst_23 = arith.constant 1.000000e+00 : f32
    %32 = vector.broadcast %cst_23 : f32 to vector<8x64xf32>
    %33 = arith.addf %32, %31 : vector<8x64xf32>
    %34 = arith.divf %32, %33 : vector<8x64xf32>
    %35 = vector.extract_strided_slice %34 {offsets = [0, 0], sizes = [8, 32], strides = [1, 1]} : vector<8x64xf32> to vector<8x32xf32>
    %36 = vector.extract_strided_slice %34 {offsets = [0, 32], sizes = [8, 32], strides = [1, 1]} : vector<8x64xf32> to vector<8x32xf32>
    %37 = vector.extract_strided_slice %25 {offsets = [0, 64], sizes = [8, 32], strides = [1, 1]} : vector<8x96xf32> to vector<8x32xf32>
    %38 = vector.extract_strided_slice %26 {offsets = [0, 64], sizes = [8, 32], strides = [1, 1]} : vector<8x96xf32> to vector<8x32xf32>
    %39 = arith.mulf %35, %38 : vector<8x32xf32>
    %40 = arith.addf %37, %39 : vector<8x32xf32>
    %41 = math.tanh %40 : vector<8x32xf32>
    %cst_24 = arith.constant 1.000000e+00 : f32
    %42 = vector.broadcast %cst_24 : f32 to vector<8x32xf32>
    %43 = arith.subf %42, %36 : vector<8x32xf32>
    %44 = arith.mulf %43, %41 : vector<8x32xf32>
    %45 = arith.mulf %36, %24 : vector<8x32xf32>
    %46 = arith.addf %44, %45 : vector<8x32xf32>
    %c0_25 = arith.constant 0 : index
    %c0_26 = arith.constant 0 : index
    %47 = vector.load %arg15[%c0_25, %c0_26] : memref<64x32xf32, #tpu.memory_space<vmem>>, vector<8x32xf32>
    tpu.vector_store %arg15[%c0_25, %c0_26], %46 {strides = array<i32>} : memref<64x32xf32, #tpu.memory_space<vmem>>, vector<8x32xf32>,
    %48 = vector.extract_strided_slice %22 {offsets = [8, 0], sizes = [8, 96], strides = [1, 1]} : vector<64x96xf32> to vector<8x96xf32>
    %cst_27 = arith.constant dense<0.000000e+00> : vector<8x96xf32>
    %49 = tpu.matmul %46, %23, %cst_27 {dimension_numbers = #tpu.dot_dimension_numbers<[1], [0], [0], [1], [0, 0, 1, 1], [], []>} : vector<8x32xf32>, vector<32x96xf32>, vector<8x96xf32> -> vector<8x96xf32>
    %50 = vector.extract_strided_slice %48 {offsets = [0, 0], sizes = [8, 64], strides = [1, 1]} : vector<8x96xf32> to vector<8x64xf32>
    %51 = vector.extract_strided_slice %49 {offsets = [0, 0], sizes = [8, 64], strides = [1, 1]} : vector<8x96xf32> to vector<8x64xf32>
    %52 = arith.addf %50, %51 : vector<8x64xf32>
    %53 = arith.negf %52 : vector<8x64xf32>
    %54 = math.exp %53 : vector<8x64xf32>
    %cst_28 = arith.constant 1.000000e+00 : f32
    %55 = vector.broadcast %cst_28 : f32 to vector<8x64xf32>
    %56 = arith.addf %55, %54 : vector<8x64xf32>
    %57 = arith.divf %55, %56 : vector<8x64xf32>
    %58 = vector.extract_strided_slice %57 {offsets = [0, 0], sizes = [8, 32], strides = [1, 1]} : vector<8x64xf32> to vector<8x32xf32>
    %59 = vector.extract_strided_slice %57 {offsets = [0, 32], sizes = [8, 32], strides = [1, 1]} : vector<8x64xf32> to vector<8x32xf32>
    %60 = vector.extract_strided_slice %48 {offsets = [0, 64], sizes = [8, 32], strides = [1, 1]} : vector<8x96xf32> to vector<8x32xf32>
    %61 = vector.extract_strided_slice %49 {offsets = [0, 64], sizes = [8, 32], strides = [1, 1]} : vector<8x96xf32> to vector<8x32xf32>
    %62 = arith.mulf %58, %61 : vector<8x32xf32>
    %63 = arith.addf %60, %62 : vector<8x32xf32>
    %64 = math.tanh %63 : vector<8x32xf32>
    %cst_29 = arith.constant 1.000000e+00 : f32
    %65 = vector.broadcast %cst_29 : f32 to vector<8x32xf32>
    %66 = arith.subf %65, %59 : vector<8x32xf32>
    %67 = arith.mulf %66, %64 : vector<8x32xf32>
    %68 = arith.mulf %59, %46 : vector<8x32xf32>
    %69 = arith.addf %67, %68 : vector<8x32xf32>
    %c8 = arith.constant 8 : index
    %c0_30 = arith.constant 0 : index
    %70 = vector.load %arg15[%c8, %c0_30] : memref<64x32xf32, #tpu.memory_space<vmem>>, vector<8x32xf32>
    tpu.vector_store %arg15[%c8, %c0_30], %69 {strides = array<i32>} : memref<64x32xf32, #tpu.memory_space<vmem>>, vector<8x32xf32>,
    %71 = vector.extract_strided_slice %22 {offsets = [16, 0], sizes = [8, 96], strides = [1, 1]} : vector<64x96xf32> to vector<8x96xf32>
    %cst_31 = arith.constant dense<0.000000e+00> : vector<8x96xf32>
    %72 = tpu.matmul %69, %23, %cst_31 {dimension_numbers = #tpu.dot_dimension_numbers<[1], [0], [0], [1], [0, 0, 1, 1], [], []>} : vector<8x32xf32>, vector<32x96xf32>, vector<8x96xf32> -> vector<8x96xf32>
    %73 = vector.extract_strided_slice %71 {offsets = [0, 0], sizes = [8, 64], strides = [1, 1]} : vector<8x96xf32> to vector<8x64xf32>
    %74 = vector.extract_strided_slice %72 {offsets = [0, 0], sizes = [8, 64], strides = [1, 1]} : vector<8x96xf32> to vector<8x64xf32>
    %75 = arith.addf %73, %74 : vector<8x64xf32>
    %76 = arith.negf %75 : vector<8x64xf32>
    %77 = math.exp %76 : vector<8x64xf32>
    %cst_32 = arith.constant 1.000000e+00 : f32
    %78 = vector.broadcast %cst_32 : f32 to vector<8x64xf32>
    %79 = arith.addf %78, %77 : vector<8x64xf32>
    %80 = arith.divf %78, %79 : vector<8x64xf32>
    %81 = vector.extract_strided_slice %80 {offsets = [0, 0], sizes = [8, 32], strides = [1, 1]} : vector<8x64xf32> to vector<8x32xf32>
    %82 = vector.extract_strided_slice %80 {offsets = [0, 32], sizes = [8, 32], strides = [1, 1]} : vector<8x64xf32> to vector<8x32xf32>
    %83 = vector.extract_strided_slice %71 {offsets = [0, 64], sizes = [8, 32], strides = [1, 1]} : vector<8x96xf32> to vector<8x32xf32>
    %84 = vector.extract_strided_slice %72 {offsets = [0, 64], sizes = [8, 32], strides = [1, 1]} : vector<8x96xf32> to vector<8x32xf32>
    %85 = arith.mulf %81, %84 : vector<8x32xf32>
    %86 = arith.addf %83, %85 : vector<8x32xf32>
    %87 = math.tanh %86 : vector<8x32xf32>
    %cst_33 = arith.constant 1.000000e+00 : f32
    %88 = vector.broadcast %cst_33 : f32 to vector<8x32xf32>
    %89 = arith.subf %88, %82 : vector<8x32xf32>
    %90 = arith.mulf %89, %87 : vector<8x32xf32>
    %91 = arith.mulf %82, %69 : vector<8x32xf32>
    %92 = arith.addf %90, %91 : vector<8x32xf32>
    %c16_34 = arith.constant 16 : index
    %c0_35 = arith.constant 0 : index
    %93 = vector.load %arg15[%c16_34, %c0_35] : memref<64x32xf32, #tpu.memory_space<vmem>>, vector<8x32xf32>
    tpu.vector_store %arg15[%c16_34, %c0_35], %92 {strides = array<i32>} : memref<64x32xf32, #tpu.memory_space<vmem>>, vector<8x32xf32>,
    %94 = vector.extract_strided_slice %22 {offsets = [24, 0], sizes = [8, 96], strides = [1, 1]} : vector<64x96xf32> to vector<8x96xf32>
    %cst_36 = arith.constant dense<0.000000e+00> : vector<8x96xf32>
    %95 = tpu.matmul %92, %23, %cst_36 {dimension_numbers = #tpu.dot_dimension_numbers<[1], [0], [0], [1], [0, 0, 1, 1], [], []>} : vector<8x32xf32>, vector<32x96xf32>, vector<8x96xf32> -> vector<8x96xf32>
    %96 = vector.extract_strided_slice %94 {offsets = [0, 0], sizes = [8, 64], strides = [1, 1]} : vector<8x96xf32> to vector<8x64xf32>
    %97 = vector.extract_strided_slice %95 {offsets = [0, 0], sizes = [8, 64], strides = [1, 1]} : vector<8x96xf32> to vector<8x64xf32>
    %98 = arith.addf %96, %97 : vector<8x64xf32>
    %99 = arith.negf %98 : vector<8x64xf32>
    %100 = math.exp %99 : vector<8x64xf32>
    %cst_37 = arith.constant 1.000000e+00 : f32
    %101 = vector.broadcast %cst_37 : f32 to vector<8x64xf32>
    %102 = arith.addf %101, %100 : vector<8x64xf32>
    %103 = arith.divf %101, %102 : vector<8x64xf32>
    %104 = vector.extract_strided_slice %103 {offsets = [0, 0], sizes = [8, 32], strides = [1, 1]} : vector<8x64xf32> to vector<8x32xf32>
    %105 = vector.extract_strided_slice %103 {offsets = [0, 32], sizes = [8, 32], strides = [1, 1]} : vector<8x64xf32> to vector<8x32xf32>
    %106 = vector.extract_strided_slice %94 {offsets = [0, 64], sizes = [8, 32], strides = [1, 1]} : vector<8x96xf32> to vector<8x32xf32>
    %107 = vector.extract_strided_slice %95 {offsets = [0, 64], sizes = [8, 32], strides = [1, 1]} : vector<8x96xf32> to vector<8x32xf32>
    %108 = arith.mulf %104, %107 : vector<8x32xf32>
    %109 = arith.addf %106, %108 : vector<8x32xf32>
    %110 = math.tanh %109 : vector<8x32xf32>
    %cst_38 = arith.constant 1.000000e+00 : f32
    %111 = vector.broadcast %cst_38 : f32 to vector<8x32xf32>
    %112 = arith.subf %111, %105 : vector<8x32xf32>
    %113 = arith.mulf %112, %110 : vector<8x32xf32>
    %114 = arith.mulf %105, %92 : vector<8x32xf32>
    %115 = arith.addf %113, %114 : vector<8x32xf32>
    %c24 = arith.constant 24 : index
    %c0_39 = arith.constant 0 : index
    %116 = vector.load %arg15[%c24, %c0_39] : memref<64x32xf32, #tpu.memory_space<vmem>>, vector<8x32xf32>
    tpu.vector_store %arg15[%c24, %c0_39], %115 {strides = array<i32>} : memref<64x32xf32, #tpu.memory_space<vmem>>, vector<8x32xf32>,
    %117 = vector.extract_strided_slice %22 {offsets = [32, 0], sizes = [8, 96], strides = [1, 1]} : vector<64x96xf32> to vector<8x96xf32>
    %cst_40 = arith.constant dense<0.000000e+00> : vector<8x96xf32>
    %118 = tpu.matmul %115, %23, %cst_40 {dimension_numbers = #tpu.dot_dimension_numbers<[1], [0], [0], [1], [0, 0, 1, 1], [], []>} : vector<8x32xf32>, vector<32x96xf32>, vector<8x96xf32> -> vector<8x96xf32>
    %119 = vector.extract_strided_slice %117 {offsets = [0, 0], sizes = [8, 64], strides = [1, 1]} : vector<8x96xf32> to vector<8x64xf32>
    %120 = vector.extract_strided_slice %118 {offsets = [0, 0], sizes = [8, 64], strides = [1, 1]} : vector<8x96xf32> to vector<8x64xf32>
    %121 = arith.addf %119, %120 : vector<8x64xf32>
    %122 = arith.negf %121 : vector<8x64xf32>
    %123 = math.exp %122 : vector<8x64xf32>
    %cst_41 = arith.constant 1.000000e+00 : f32
    %124 = vector.broadcast %cst_41 : f32 to vector<8x64xf32>
    %125 = arith.addf %124, %123 : vector<8x64xf32>
    %126 = arith.divf %124, %125 : vector<8x64xf32>
    %127 = vector.extract_strided_slice %126 {offsets = [0, 0], sizes = [8, 32], strides = [1, 1]} : vector<8x64xf32> to vector<8x32xf32>
    %128 = vector.extract_strided_slice %126 {offsets = [0, 32], sizes = [8, 32], strides = [1, 1]} : vector<8x64xf32> to vector<8x32xf32>
    %129 = vector.extract_strided_slice %117 {offsets = [0, 64], sizes = [8, 32], strides = [1, 1]} : vector<8x96xf32> to vector<8x32xf32>
    %130 = vector.extract_strided_slice %118 {offsets = [0, 64], sizes = [8, 32], strides = [1, 1]} : vector<8x96xf32> to vector<8x32xf32>
    %131 = arith.mulf %127, %130 : vector<8x32xf32>
    %132 = arith.addf %129, %131 : vector<8x32xf32>
    %133 = math.tanh %132 : vector<8x32xf32>
    %cst_42 = arith.constant 1.000000e+00 : f32
    %134 = vector.broadcast %cst_42 : f32 to vector<8x32xf32>
    %135 = arith.subf %134, %128 : vector<8x32xf32>
    %136 = arith.mulf %135, %133 : vector<8x32xf32>
    %137 = arith.mulf %128, %115 : vector<8x32xf32>
    %138 = arith.addf %136, %137 : vector<8x32xf32>
    %c32 = arith.constant 32 : index
    %c0_43 = arith.constant 0 : index
    %139 = vector.load %arg15[%c32, %c0_43] : memref<64x32xf32, #tpu.memory_space<vmem>>, vector<8x32xf32>
    tpu.vector_store %arg15[%c32, %c0_43], %138 {strides = array<i32>} : memref<64x32xf32, #tpu.memory_space<vmem>>, vector<8x32xf32>,
    %140 = vector.extract_strided_slice %22 {offsets = [40, 0], sizes = [8, 96], strides = [1, 1]} : vector<64x96xf32> to vector<8x96xf32>
    %cst_44 = arith.constant dense<0.000000e+00> : vector<8x96xf32>
    %141 = tpu.matmul %138, %23, %cst_44 {dimension_numbers = #tpu.dot_dimension_numbers<[1], [0], [0], [1], [0, 0, 1, 1], [], []>} : vector<8x32xf32>, vector<32x96xf32>, vector<8x96xf32> -> vector<8x96xf32>
    %142 = vector.extract_strided_slice %140 {offsets = [0, 0], sizes = [8, 64], strides = [1, 1]} : vector<8x96xf32> to vector<8x64xf32>
    %143 = vector.extract_strided_slice %141 {offsets = [0, 0], sizes = [8, 64], strides = [1, 1]} : vector<8x96xf32> to vector<8x64xf32>
    %144 = arith.addf %142, %143 : vector<8x64xf32>
    %145 = arith.negf %144 : vector<8x64xf32>
    %146 = math.exp %145 : vector<8x64xf32>
    %cst_45 = arith.constant 1.000000e+00 : f32
    %147 = vector.broadcast %cst_45 : f32 to vector<8x64xf32>
    %148 = arith.addf %147, %146 : vector<8x64xf32>
    %149 = arith.divf %147, %148 : vector<8x64xf32>
    %150 = vector.extract_strided_slice %149 {offsets = [0, 0], sizes = [8, 32], strides = [1, 1]} : vector<8x64xf32> to vector<8x32xf32>
    %151 = vector.extract_strided_slice %149 {offsets = [0, 32], sizes = [8, 32], strides = [1, 1]} : vector<8x64xf32> to vector<8x32xf32>
    %152 = vector.extract_strided_slice %140 {offsets = [0, 64], sizes = [8, 32], strides = [1, 1]} : vector<8x96xf32> to vector<8x32xf32>
    %153 = vector.extract_strided_slice %141 {offsets = [0, 64], sizes = [8, 32], strides = [1, 1]} : vector<8x96xf32> to vector<8x32xf32>
    %154 = arith.mulf %150, %153 : vector<8x32xf32>
    %155 = arith.addf %152, %154 : vector<8x32xf32>
    %156 = math.tanh %155 : vector<8x32xf32>
    %cst_46 = arith.constant 1.000000e+00 : f32
    %157 = vector.broadcast %cst_46 : f32 to vector<8x32xf32>
    %158 = arith.subf %157, %151 : vector<8x32xf32>
    %159 = arith.mulf %158, %156 : vector<8x32xf32>
    %160 = arith.mulf %151, %138 : vector<8x32xf32>
    %161 = arith.addf %159, %160 : vector<8x32xf32>
    %c40 = arith.constant 40 : index
    %c0_47 = arith.constant 0 : index
    %162 = vector.load %arg15[%c40, %c0_47] : memref<64x32xf32, #tpu.memory_space<vmem>>, vector<8x32xf32>
    tpu.vector_store %arg15[%c40, %c0_47], %161 {strides = array<i32>} : memref<64x32xf32, #tpu.memory_space<vmem>>, vector<8x32xf32>,
    %163 = vector.extract_strided_slice %22 {offsets = [48, 0], sizes = [8, 96], strides = [1, 1]} : vector<64x96xf32> to vector<8x96xf32>
    %cst_48 = arith.constant dense<0.000000e+00> : vector<8x96xf32>
    %164 = tpu.matmul %161, %23, %cst_48 {dimension_numbers = #tpu.dot_dimension_numbers<[1], [0], [0], [1], [0, 0, 1, 1], [], []>} : vector<8x32xf32>, vector<32x96xf32>, vector<8x96xf32> -> vector<8x96xf32>
    %165 = vector.extract_strided_slice %163 {offsets = [0, 0], sizes = [8, 64], strides = [1, 1]} : vector<8x96xf32> to vector<8x64xf32>
    %166 = vector.extract_strided_slice %164 {offsets = [0, 0], sizes = [8, 64], strides = [1, 1]} : vector<8x96xf32> to vector<8x64xf32>
    %167 = arith.addf %165, %166 : vector<8x64xf32>
    %168 = arith.negf %167 : vector<8x64xf32>
    %169 = math.exp %168 : vector<8x64xf32>
    %cst_49 = arith.constant 1.000000e+00 : f32
    %170 = vector.broadcast %cst_49 : f32 to vector<8x64xf32>
    %171 = arith.addf %170, %169 : vector<8x64xf32>
    %172 = arith.divf %170, %171 : vector<8x64xf32>
    %173 = vector.extract_strided_slice %172 {offsets = [0, 0], sizes = [8, 32], strides = [1, 1]} : vector<8x64xf32> to vector<8x32xf32>
    %174 = vector.extract_strided_slice %172 {offsets = [0, 32], sizes = [8, 32], strides = [1, 1]} : vector<8x64xf32> to vector<8x32xf32>
    %175 = vector.extract_strided_slice %163 {offsets = [0, 64], sizes = [8, 32], strides = [1, 1]} : vector<8x96xf32> to vector<8x32xf32>
    %176 = vector.extract_strided_slice %164 {offsets = [0, 64], sizes = [8, 32], strides = [1, 1]} : vector<8x96xf32> to vector<8x32xf32>
    %177 = arith.mulf %173, %176 : vector<8x32xf32>
    %178 = arith.addf %175, %177 : vector<8x32xf32>
    %179 = math.tanh %178 : vector<8x32xf32>
    %cst_50 = arith.constant 1.000000e+00 : f32
    %180 = vector.broadcast %cst_50 : f32 to vector<8x32xf32>
    %181 = arith.subf %180, %174 : vector<8x32xf32>
    %182 = arith.mulf %181, %179 : vector<8x32xf32>
    %183 = arith.mulf %174, %161 : vector<8x32xf32>
    %184 = arith.addf %182, %183 : vector<8x32xf32>
    %c48 = arith.constant 48 : index
    %c0_51 = arith.constant 0 : index
    %185 = vector.load %arg15[%c48, %c0_51] : memref<64x32xf32, #tpu.memory_space<vmem>>, vector<8x32xf32>
    tpu.vector_store %arg15[%c48, %c0_51], %184 {strides = array<i32>} : memref<64x32xf32, #tpu.memory_space<vmem>>, vector<8x32xf32>,
    %186 = vector.extract_strided_slice %22 {offsets = [56, 0], sizes = [8, 96], strides = [1, 1]} : vector<64x96xf32> to vector<8x96xf32>
    %cst_52 = arith.constant dense<0.000000e+00> : vector<8x96xf32>
    %187 = tpu.matmul %184, %23, %cst_52 {dimension_numbers = #tpu.dot_dimension_numbers<[1], [0], [0], [1], [0, 0, 1, 1], [], []>} : vector<8x32xf32>, vector<32x96xf32>, vector<8x96xf32> -> vector<8x96xf32>
    %188 = vector.extract_strided_slice %186 {offsets = [0, 0], sizes = [8, 64], strides = [1, 1]} : vector<8x96xf32> to vector<8x64xf32>
    %189 = vector.extract_strided_slice %187 {offsets = [0, 0], sizes = [8, 64], strides = [1, 1]} : vector<8x96xf32> to vector<8x64xf32>
    %190 = arith.addf %188, %189 : vector<8x64xf32>
    %191 = arith.negf %190 : vector<8x64xf32>
    %192 = math.exp %191 : vector<8x64xf32>
    %cst_53 = arith.constant 1.000000e+00 : f32
    %193 = vector.broadcast %cst_53 : f32 to vector<8x64xf32>
    %194 = arith.addf %193, %192 : vector<8x64xf32>
    %195 = arith.divf %193, %194 : vector<8x64xf32>
    %196 = vector.extract_strided_slice %195 {offsets = [0, 0], sizes = [8, 32], strides = [1, 1]} : vector<8x64xf32> to vector<8x32xf32>
    %197 = vector.extract_strided_slice %195 {offsets = [0, 32], sizes = [8, 32], strides = [1, 1]} : vector<8x64xf32> to vector<8x32xf32>
    %198 = vector.extract_strided_slice %186 {offsets = [0, 64], sizes = [8, 32], strides = [1, 1]} : vector<8x96xf32> to vector<8x32xf32>
    %199 = vector.extract_strided_slice %187 {offsets = [0, 64], sizes = [8, 32], strides = [1, 1]} : vector<8x96xf32> to vector<8x32xf32>
    %200 = arith.mulf %196, %199 : vector<8x32xf32>
    %201 = arith.addf %198, %200 : vector<8x32xf32>
    %202 = math.tanh %201 : vector<8x32xf32>
    %cst_54 = arith.constant 1.000000e+00 : f32
    %203 = vector.broadcast %cst_54 : f32 to vector<8x32xf32>
    %204 = arith.subf %203, %197 : vector<8x32xf32>
    %205 = arith.mulf %204, %202 : vector<8x32xf32>
    %206 = arith.mulf %197, %184 : vector<8x32xf32>
    %207 = arith.addf %205, %206 : vector<8x32xf32>
    %c56 = arith.constant 56 : index
    %c0_55 = arith.constant 0 : index
    %208 = vector.load %arg15[%c56, %c0_55] : memref<64x32xf32, #tpu.memory_space<vmem>>, vector<8x32xf32>
    tpu.vector_store %arg15[%c56, %c0_55], %207 {strides = array<i32>} : memref<64x32xf32, #tpu.memory_space<vmem>>, vector<8x32xf32>,
    %c0_56 = arith.constant 0 : index
    %c0_57 = arith.constant 0 : index
    %209 = vector.load %arg15[%c0_56, %c0_57] : memref<64x32xf32, #tpu.memory_space<vmem>>, vector<64x32xf32>
    %c0_58 = arith.constant 0 : index
    %c0_59 = arith.constant 0 : index
    %210 = vector.load %arg8[%c0_58, %c0_59] : memref<64x32xf32, #tpu.memory_space<vmem>>, vector<32x32xf32>
    %cst_60 = arith.constant dense<0.000000e+00> : vector<64x32xf32>
    %211 = tpu.matmul %209, %210, %cst_60 {dimension_numbers = #tpu.dot_dimension_numbers<[1], [0], [0], [1], [0, 0, 1, 1], [], []>} : vector<64x32xf32>, vector<32x32xf32>, vector<64x32xf32> -> vector<64x32xf32>
    %c32_61 = arith.constant 32 : index
    %c0_62 = arith.constant 0 : index
    %212 = vector.load %arg8[%c32_61, %c0_62] : memref<64x32xf32, #tpu.memory_space<vmem>>, vector<32x32xf32>
    %cst_63 = arith.constant dense<0.000000e+00> : vector<64x32xf32>
    %213 = tpu.matmul %17, %212, %cst_63 {dimension_numbers = #tpu.dot_dimension_numbers<[1], [0], [0], [1], [0, 0, 1, 1], [], []>} : vector<64x32xf32>, vector<32x32xf32>, vector<64x32xf32> -> vector<64x32xf32>
    %214 = arith.addf %211, %213 : vector<64x32xf32>
    %c0_64 = arith.constant 0 : index
    %c0_65 = arith.constant 0 : index
    %215 = vector.load %arg9[%c0_64, %c0_65] : memref<1x32xf32, #tpu.memory_space<vmem>>, vector<1x32xf32>
    %216 = vector.broadcast %215 : vector<1x32xf32> to vector<64x32xf32>
    %217 = arith.addf %214, %216 : vector<64x32xf32>
    %cst_66 = arith.constant 0.000000e+00 : f32
    %218 = vector.broadcast %cst_66 : f32 to vector<64x32xf32>
    %219 = arith.maximumf %217, %218 : vector<64x32xf32>
    %c0_67 = arith.constant 0 : index
    %c0_68 = arith.constant 0 : index
    %220 = vector.load %arg10[%c0_67, %c0_68] : memref<32x32xf32, #tpu.memory_space<vmem>>, vector<32x32xf32>
    %cst_69 = arith.constant dense<0.000000e+00> : vector<64x32xf32>
    %221 = tpu.matmul %219, %220, %cst_69 {dimension_numbers = #tpu.dot_dimension_numbers<[1], [0], [0], [1], [0, 0, 1, 1], [], []>} : vector<64x32xf32>, vector<32x32xf32>, vector<64x32xf32> -> vector<64x32xf32>
    %c0_70 = arith.constant 0 : index
    %c0_71 = arith.constant 0 : index
    %222 = vector.load %arg11[%c0_70, %c0_71] : memref<1x32xf32, #tpu.memory_space<vmem>>, vector<1x32xf32>
    %223 = vector.broadcast %222 : vector<1x32xf32> to vector<64x32xf32>
    %224 = arith.addf %221, %223 : vector<64x32xf32>
    %cst_72 = arith.constant 0.000000e+00 : f32
    %225 = vector.broadcast %cst_72 : f32 to vector<64x32xf32>
    %226 = arith.maximumf %224, %225 : vector<64x32xf32>
    %c0_73 = arith.constant 0 : index
    %c0_74 = arith.constant 0 : index
    %227 = vector.load %arg12[%c0_73, %c0_74] : memref<32x4xf32, #tpu.memory_space<vmem>>, vector<32x4xf32>
    %cst_75 = arith.constant dense<0.000000e+00> : vector<64x4xf32>
    %228 = tpu.matmul %226, %227, %cst_75 {dimension_numbers = #tpu.dot_dimension_numbers<[1], [0], [0], [1], [0, 0, 1, 1], [], []>} : vector<64x32xf32>, vector<32x4xf32>, vector<64x4xf32> -> vector<64x4xf32>
    %c0_76 = arith.constant 0 : index
    %c0_77 = arith.constant 0 : index
    %229 = vector.load %arg13[%c0_76, %c0_77] : memref<1x4xf32, #tpu.memory_space<vmem>>, vector<1x4xf32>
    %230 = vector.broadcast %229 : vector<1x4xf32> to vector<64x4xf32>
    %231 = arith.addf %228, %230 : vector<64x4xf32>
    %232 = math.tanh %231 : vector<64x4xf32>
    %c0_78 = arith.constant 0 : index
    %c0_79 = arith.constant 0 : index
    %233 = vector.load %arg14[%c0_78, %c0_79] : memref<64x4xf32, #tpu.memory_space<vmem>>, vector<64x4xf32>
    tpu.vector_store %arg14[%c0_78, %c0_79], %232 {strides = array<i32>} : memref<64x4xf32, #tpu.memory_space<vmem>>, vector<64x4xf32>,
    return
  }
}

</mosaic_0001>

<bundles_post_ra>
// kernel: tpu_custom_call.1
= control target key start
LH: loop header
LB: loop body
LE: loop exit
PB: predicated region body
PF: predicated region fallthrough
CT: control target
= control target key end

     0   :  { %vm93_vm0 = vcmask 1043456   ;;  %vm68_vm1 = vcmask 31744   ;;  %vm152_vm2 = vcmask 130048   ;;  %v1396_v23 = vmov 0.0   ;;  %s1953_s2 = inlined_call_operand.vmem [shape: f32[4,16], index: 2, kind: input, shape index: {}]   ;;  %s1954_s4 = inlined_call_operand.vmem [shape: f32[16,64], index: 4, kind: input, shape index: {}]   ;;  %s1955_s0 = inlined_call_operand.vmem [shape: f32[64,4], index: 0, kind: input, shape index: {}]   ;;  %s1956_s7 = inlined_call_operand.vmem [shape: f32[32,96], index: 7, kind: input, shape index: {}]   ;;  %s1957_s1 = inlined_call_operand.vmem [shape: f32[64,16], index: 1, kind: input, shape index: {}]   ;;  %s1958_s3 = inlined_call_operand.vmem [shape: f32[1,16], index: 3, kind: input, shape index: {}]   ;;  %s1959_s5 = inlined_call_operand.vmem [shape: f32[1,64], index: 5, kind: input, shape index: {}]   ;;  %s1960_s6 = inlined_call_operand.vmem [shape: f32[48,96], index: 6, kind: input, shape index: {}]   ;;  %s1961_s8 = inlined_call_operand.vmem [shape: f32[64,32], index: 8, kind: input, shape index: {}]   ;;  %s1962_s9 = inlined_call_operand.vmem [shape: f32[1,32], index: 9, kind: input, shape index: {}]   ;;  %s1963_s10 = inlined_call_operand.vmem [shape: f32[32,32], index: 10, kind: input, shape index: {}]   ;;  %s1964_s11 = inlined_call_operand.vmem [shape: f32[1,32], index: 11, kind: input, shape index: {}]   ;;  %s1965_s12 = inlined_call_operand.vmem [shape: f32[32,4], index: 12, kind: input, shape index: {}]   ;;  %s1966_s13 = inlined_call_operand.vmem [shape: f32[1,4], index: 13, kind: input, shape index: {}]   ;;  %s1967_s14 = inlined_call_operand.vmem [shape: f32[64,4], index: 14, kind: output, shape index: {}]  }
   0x1   :  { %v63_v0 = vld [vmem:[%s1953_s2] sm:$0xf]  ;;  %v147_v1 = vld [vmem:[%s1954_s4 + $0x8] sm:$0xff]  ;;  %v1486_v3 = vld [vmem:[%s1956_s7 + $0x18] sm:$0xff]  ;;  %vm232_vm3 = vcmask 261120  }
   0x2   :  { %v47_v2 = vld [vmem:[%s1955_s0] sm:$0xff]  ;;  %1244 = vmatpush.msk.msra.mxu0 %vm93_vm0, %v63_v0  ;;  %191 = vmatpush.msra.mxu1 %v147_v1  ;;  %v1499_v6 = vld [vmem:[%s1956_s7 + $0x10] sm:$0xff]  ;;  %v1505_v7 = vld [vmem:[%s1956_s7 + $0x8] sm:$0xff] }
   0x3   :  { %v146_v4 = vld [vmem:[%s1954_s4] sm:$0xff]  ;;  %1245 = vmatmul.msk.f32.vlgmr.msra.gmra.mxu0 %vm68_vm1, %v47_v2  ;;  %v48_v8 = vld [vmem:[%s1955_s0 + $0x8] sm:$0xff]  ;;  %v49_v10 = vld [vmem:[%s1955_s0 + $0x10] sm:$0xff] }
   0x4   :  { %v55_v5 = vld [vmem:[%s1957_s1] sm:$0xff]  ;;  %382 = vmatpush.msrb.mxu0 %v1486_v3  ;;  %192 = vmatpush.msra.mxu1 %v146_v4  ;;  %v56_v9 = vld [vmem:[%s1957_s1 + $0x8] sm:$0xff]  ;;  %v57_v11 = vld [vmem:[%s1957_s1 + $0x10] sm:$0xff] }
   0x5   :  { %1253 = vmatmul.msk.f32.vlgmr.msra.gmra.mxu1 %vm152_vm2, %v55_v5  ;;  %v1530_v12 = vld [vmem:[%s1956_s7] sm:$0xff]  ;;  %v50_v13 = vld [vmem:[%s1955_s0 + $0x18] sm:$0xff]  ;;  %v52_v17 = vld [vmem:[%s1955_s0 + $0x28] sm:$0xff] }
   0x6   :  { %383 = vmatpush.msrb.mxu0 %v1499_v6  ;;  %448 = vmatpush.msrb.mxu1 %v1486_v3  ;;  %v58_v14 = vld [vmem:[%s1957_s1 + $0x18] sm:$0xff]  ;;  %v51_v15 = vld [vmem:[%s1955_s0 + $0x20] sm:$0xff]  ;;  %v60_v18 = vld [vmem:[%s1957_s1 + $0x28] sm:$0xff] }
   0x7   :  { %v59_v16 = vld [vmem:[%s1957_s1 + $0x20] sm:$0xff]  ;;  %v53_v19 = vld [vmem:[%s1955_s0 + $0x30] sm:$0xff]  ;;  %v54_v21 = vld [vmem:[%s1955_s0 + $0x38] sm:$0xff] }
   0x8   :  { %384 = vmatpush.msrb.mxu0 %v1505_v7  ;;  %449 = vmatpush.msrb.mxu1 %v1499_v6  ;;  %v61_v20 = vld [vmem:[%s1957_s1 + $0x30] sm:$0xff]  ;;  %v62_v22 = vld [vmem:[%s1957_s1 + $0x38] sm:$0xff]  ;;  %v231_v24 = vld [vmem:[%s1960_s6 + $0x28] sm:$0xff] }
   0x9   :  { %269 = vmatpush.msra.mxu2 %v231_v24  ;;  %v230_v25 = vld [vmem:[%s1960_s6 + $0x20] sm:$0xff]  ;;  %v227_v26 = vld [vmem:[%s1960_s6 + $0x8] sm:$0xff]  ;;  %v229_v27 = vld [vmem:[%s1960_s6 + $0x18] sm:$0xff] }
   0xa   :  { %450 = vmatpush.msrb.mxu1 %v1505_v7  ;;  %385 = vmatpush.msrb.mxu0 %v1530_v12  ;;  %v226_v28 = vld [vmem:[%s1960_s6] sm:$0xff]  ;;  %v228_v29 = vld [vmem:[%s1960_s6 + $0x10] sm:$0xff] }
   0xb   :  { %1246 = vmatmul.msk.f32.gmra.mxu0 %vm68_vm1, %v48_v8  ;;  %270 = vmatpush.msra.mxu2 %v230_v25  ;;  %v1612_v30 = vld [vmem:[%s1958_s3] ss:$0 sm:$0xff]  ;;  %s1397_s3 = smov 64  }
   0xc   :  { %451 = vmatpush.msrb.mxu1 %v1530_v12  ;;  %646 = vmatpush.msra.mxu0 %v1486_v3  ;;  %v1617_v31 = vld [vmem:[%s1959_s5] ss:$0 sm:$0xff]  ;;  %s1398_s5 = smov 96  }
   0xd   :  { %1254 = vmatmul.msk.f32.gmra.mxu1 %vm152_vm2, %v56_v9  ;;  %336 = vmatpush.msra.mxu3 %v227_v26 }
   0xe   :  { %712 = vmatpush.msra.mxu1 %v1486_v3  ;;  %647 = vmatpush.msra.mxu0 %v1499_v6 }
   0xf   :  { %271 = vmatpush.msra.mxu2 %v229_v27  ;;  %337 = vmatpush.msra.mxu3 %v226_v28 }
  0x10   :  { %713 = vmatpush.msra.mxu1 %v1499_v6  ;;  %648 = vmatpush.msra.mxu0 %v1505_v7 }
  0x11   :  { %514 = vmatpush.msrb.mxu3 %v1486_v3  ;;  %272 = vmatpush.msra.mxu2 %v228_v29 }
  0x12   :  { %714 = vmatpush.msra.mxu1 %v1505_v7  ;;  %649 = vmatpush.msra.mxu0 %v1530_v12 }
  0x13   :  { %1247 = vmatmul.msk.f32.gmra.mxu0 %vm68_vm1, %v49_v10  ;;  %515 = vmatpush.msrb.mxu3 %v1499_v6 }
  0x14   :  { %715 = vmatpush.msra.mxu1 %v1530_v12  ;;  %580 = vmatpush.msrb.mxu2 %v1486_v3 }
  0x15   :  { %1255 = vmatmul.msk.f32.gmra.mxu1 %vm152_vm2, %v57_v11  ;;  %516 = vmatpush.msrb.mxu3 %v1505_v7 }
  0x16   :  { %581 = vmatpush.msrb.mxu2 %v1499_v6 }
  0x17   :  { %517 = vmatpush.msrb.mxu3 %v1530_v12 }
  0x18   :  { %582 = vmatpush.msrb.mxu2 %v1505_v7 }
  0x1a   :  { %583 = vmatpush.msrb.mxu2 %v1530_v12 }
  0x1b   :  { %1248 = vmatmul.msk.f32.gmra.mxu0 %vm68_vm1, %v50_v13 }
  0x1d   :  { %1256 = vmatmul.msk.f32.gmra.mxu1 %vm152_vm2, %v58_v14 }
  0x23   :  { %1249 = vmatmul.msk.f32.gmra.mxu0 %vm68_vm1, %v51_v15 }
  0x25   :  { %1257 = vmatmul.msk.f32.gmra.mxu1 %vm152_vm2, %v59_v16 }
  0x2b   :  { %1250 = vmatmul.msk.f32.gmra.mxu0 %vm68_vm1, %v52_v17 }
  0x2d   :  { %1258 = vmatmul.msk.f32.gmra.mxu1 %vm152_vm2, %v60_v18 }
  0x33   :  { %1251 = vmatmul.msk.f32.gmra.mxu0 %vm68_vm1, %v53_v19 }
  0x35   :  { %1259 = vmatmul.msk.f32.gmra.mxu1 %vm152_vm2, %v61_v20 }
  0x3b   :  { %1252 = vmatmul.msk.f32.gmra.mxu0 %vm68_vm1, %v54_v21 }
  0x3d   :  { %1260 = vmatmul.msk.f32.gmra.mxu1 %vm152_vm2, %v62_v22 }
  0x43   :  { %386 = vmatmul.f32.vlgmr.msrb.gmra.mxu0 %v1396_v23 }
  0x80   :  { %v114_v32 = vpop.f32.mrf.mxu0 }
  0x81   :  { %v115_v33 = vadd.f32 %v1612_v30, %v114_v32 }
  0x82   :  { %v194_v34 = vpop.f32.mrf.mxu1 }
  0x83   :  { %v138_v35 = vmax.f32 %v115_v33, 0.0  ;;  %v1621_v36 = vadd.f32 %v1617_v31, %v194_v34 }
  0x85   :  { %v218_v37 = vmax.f32 %v1621_v36, 0.0  ;;  %1269 = vmatmul.msk.f32.vlgmr.msra.gmra.mxu3 %vm152_vm2, %v138_v35  ;;  %v910_v36 = vld [vmem:[%s1961_s8 + $0x30] sm:$0xff] }
  0x86   :  { %778 = vmatpush.msra.mxu3 %v1486_v3 }
  0x87   :  { %1261 = vmatmul.msk.f32.vlgmr.msra.gmra.mxu2 %vm232_vm3, %v218_v37 }
  0x88   :  { %v117_v38 = vpop.f32.mrf.mxu0  ;;  %779 = vmatpush.msra.mxu3 %v1499_v6  ;;  %844 = vmatpush.msra.mxu2 %v1486_v3 }
  0x89   :  { %v118_v39 = vadd.f32 %v1612_v30, %v117_v38 }
  0x8a   :  { %v197_v40 = vpop.f32.mrf.mxu1  ;;  %780 = vmatpush.msra.mxu3 %v1505_v7  ;;  %845 = vmatpush.msra.mxu2 %v1499_v6 }
  0x8b   :  { %v139_v41 = vmax.f32 %v118_v39, 0.0  ;;  %v1635_v42 = vadd.f32 %v1617_v31, %v197_v40 }
  0x8c   :  { %781 = vmatpush.msra.mxu3 %v1530_v12  ;;  %846 = vmatpush.msra.mxu2 %v1505_v7 }
  0x8d   :  { %v219_v43 = vmax.f32 %v1635_v42, 0.0  ;;  %1270 = vmatmul.msk.f32.gmra.mxu3 %vm152_vm2, %v139_v41 }
  0x8e   :  { %847 = vmatpush.msra.mxu2 %v1530_v12 }
  0x8f   :  { %1262 = vmatmul.msk.f32.gmra.mxu2 %vm232_vm3, %v219_v43 }
  0x90   :  { %v120_v44 = vpop.f32.mrf.mxu0 }
  0x91   :  { %v121_v45 = vadd.f32 %v1612_v30, %v120_v44 }
  0x92   :  { %v200_v46 = vpop.f32.mrf.mxu1 }
  0x93   :  { %v140_v47 = vmax.f32 %v121_v45, 0.0  ;;  %v1647_v48 = vadd.f32 %v1617_v31, %v200_v46 }
  0x95   :  { %v220_v49 = vmax.f32 %v1647_v48, 0.0  ;;  %1271 = vmatmul.msk.f32.gmra.mxu3 %vm152_vm2, %v140_v47  ;;  %v908_v48 = vld [vmem:[%s1961_s8 + $0x20] sm:$0xff] }
  0x97   :  { %1263 = vmatmul.msk.f32.gmra.mxu2 %vm232_vm3, %v220_v49 }
  0x98   :  { %v123_v50 = vpop.f32.mrf.mxu0 }
  0x99   :  { %v124_v51 = vadd.f32 %v1612_v30, %v123_v50 }
  0x9a   :  { %v203_v52 = vpop.f32.mrf.mxu1 }
  0x9b   :  { %v141_v53 = vmax.f32 %v124_v51, 0.0  ;;  %v1656_v54 = vadd.f32 %v1617_v31, %v203_v52 }
  0x9d   :  { %v221_v55 = vmax.f32 %v1656_v54, 0.0  ;;  %1272 = vmatmul.msk.f32.gmra.mxu3 %vm152_vm2, %v141_v53 }
  0x9f   :  { %1264 = vmatmul.msk.f32.gmra.mxu2 %vm232_vm3, %v221_v55 }
  0xa0   :  { %v126_v56 = vpop.f32.mrf.mxu0 }
  0xa1   :  { %v127_v57 = vadd.f32 %v1612_v30, %v126_v56 }
  0xa2   :  { %v206_v58 = vpop.f32.mrf.mxu1 }
  0xa3   :  { %v142_v59 = vmax.f32 %v127_v57, 0.0  ;;  %v1665_v60 = vadd.f32 %v1617_v31, %v206_v58 }
  0xa5   :  { %v222_v61 = vmax.f32 %v1665_v60, 0.0  ;;  %1273 = vmatmul.msk.f32.gmra.mxu3 %vm152_vm2, %v142_v59 }
  0xa7   :  { %1265 = vmatmul.msk.f32.gmra.mxu2 %vm232_vm3, %v222_v61 }
  0xa8   :  { %v129_v62 = vpop.f32.mrf.mxu0 }
  0xa9   :  { %v130_v63 = vadd.f32 %v1612_v30, %v129_v62 }
  0xaa   :  { %v209_v0 = vpop.f32.mrf.mxu1 }
  0xab   :  { %v143_v1 = vmax.f32 %v130_v63, 0.0  ;;  %v1674_v2 = vadd.f32 %v1617_v31, %v209_v0 }
  0xad   :  { %v223_v3 = vmax.f32 %v1674_v2, 0.0  ;;  %1274 = vmatmul.msk.f32.gmra.mxu3 %vm152_vm2, %v143_v1 }
  0xaf   :  { %1266 = vmatmul.msk.f32.gmra.mxu2 %vm232_vm3, %v223_v3 }
  0xb0   :  { %v132_v4 = vpop.f32.mrf.mxu0 }
  0xb1   :  { %v133_v5 = vadd.f32 %v1612_v30, %v132_v4 }
  0xb2   :  { %v212_v6 = vpop.f32.mrf.mxu1 }
  0xb3   :  { %v144_v7 = vmax.f32 %v133_v5, 0.0  ;;  %v1683_v8 = vadd.f32 %v1617_v31, %v212_v6 }
  0xb5   :  { %v224_v9 = vmax.f32 %v1683_v8, 0.0  ;;  %1275 = vmatmul.msk.f32.gmra.mxu3 %vm152_vm2, %v144_v7  ;;  %v1874_v8 = vld [vmem:[%s1966_s13] ss:$0 sm:$0xff] }
  0xb7   :  { %1267 = vmatmul.msk.f32.gmra.mxu2 %vm232_vm3, %v224_v9 }
  0xb8   :  { %v135_v10 = vpop.f32.mrf.mxu0 }
  0xb9   :  { %v136_v11 = vadd.f32 %v1612_v30, %v135_v10 }
  0xba   :  { %v215_v12 = vpop.f32.mrf.mxu1 }
  0xbb   :  { %v145_v13 = vmax.f32 %v136_v11, 0.0  ;;  %v1692_v14 = vadd.f32 %v1617_v31, %v215_v12 }
  0xbd   :  { %v225_v15 = vmax.f32 %v1692_v14, 0.0  ;;  %1276 = vmatmul.msk.f32.gmra.mxu3 %vm152_vm2, %v145_v13  ;;  %v1073_v14 = vld [vmem:[%s1963_s10 + $0x18] sm:$0xff] }
  0xbf   :  { %1268 = vmatmul.msk.f32.gmra.mxu2 %vm232_vm3, %v225_v15 }
  0xc0   :  { %v387_v16 = vpop.f32.mrf.mxu0 }
  0xc1   :  { %411 = vrot.lane.b32.xlu0 %v387_v16, %s1397_s3 }
 0x108   :  { %v339_v17 = vpop.f32.mrf.mxu3 }
 0x10a   :  { %v274_v18 = vpop.f32.mrf.mxu2 }
 0x10b   :  { %v340_v19 = vadd.f32 %v339_v17, %v274_v18 }
 0x10d   :  { %v390_v20 = vadd.f32 %v387_v16, %v340_v19 }
 0x10f   :  { %v1277_v21 = vmul.f32 -1.442695, %v390_v20 }
 0x110   :  { %v342_v22 = vpop.f32.mrf.mxu3 }
 0x111   :  { %1332 = vpow2.f32 %v1277_v21 }
 0x112   :  { %v277_v23 = vpop.f32.mrf.mxu2 }
 0x113   :  { %v343_v12 = vadd.f32 %v342_v22, %v277_v23 }
 0x117   :  { %v1333_v24 = vpop.eup %1332 }
 0x118   :  { %v394_v25 = vadd.f32 1.0, %v1333_v24  ;;  %v1700_v26 = vpop.f32.mrf.mxu3 }
 0x11a   :  { %1334 = vrcp.f32 %v394_v25  ;;  %v1702_v27 = vpop.f32.mrf.mxu2  ;;  %v406_v41 = vand.u32 2147483648, %v394_v25  ;;  %vm400_vm5 = vweird.f32 %v394_v25  ;;  %v404_v44 = vand.u32 2147483647, %v394_v25 }
 0x11c   :  { %v407_v47 = vor.u32 1.1754944e-38, %v406_v41  ;;  %vm405_vm7 = vcmp.eq.f32.partialorder %v404_v44, 8.507059e+37 }
 0x120   :  { %v1335_v28 = vpop.eup %1334  ;;  %v348_v29 = vpop.f32.mrf.mxu3 }
 0x121   :  { %v396_v30 = vmul.f32 %v1335_v28, %v394_v25  ;;  %vm401_vm4 = vweird.f32 %v1335_v28 }
 0x122   :  { %v283_v31 = vpop.f32.mrf.mxu2  ;;  %vm402_vm6 = vmor %vm400_vm5, %vm401_vm4 }
 0x123   :  { %v1704_v32 = vadd.f32 %v348_v29, %v283_v31  ;;  %v397_v33 = vsub.f32 1.0, %v396_v30 }
 0x125   :  { %v398_v35 = vmul.f32 %v1335_v28, %v397_v33 }
 0x127   :  { %v399_v40 = vadd.f32 %v1335_v28, %v398_v35 }
 0x128   :  { %v351_v34 = vpop.f32.mrf.mxu3 }
 0x129   :  { %v403_v46 = vsel %vm402_vm6, %v1335_v28, %v399_v40 }
 0x12a   :  { %v286_v38 = vpop.f32.mrf.mxu2  ;;  %v408_v53 = vsel %vm405_vm7, %v407_v47, %v403_v46 }
 0x12b   :  { %v1706_v39 = vadd.f32 %v351_v34, %v286_v38  ;;  %v421_v1 = vsub.f32 1.0, %v408_v53  ;;  %v427_v5 = vmul.f32 0.0, %v408_v53 }
 0x130   :  { %v354_v45 = vpop.f32.mrf.mxu3 }
 0x132   :  { %v289_v50 = vpop.f32.mrf.mxu2 }
 0x133   :  { %v1708_v51 = vadd.f32 %v354_v45, %v289_v50  ;;  %v412_v52 = vpop.permute.xlu0 %411 }
 0x134   :  { %v414_v56 = vmul.f32 %v412_v52, %v408_v53  ;;  %v346_v53 = vadd.f32 %v1700_v26, %v1702_v27 }
 0x136   :  { %416 = vrot.lane.b32.xlu0 %v414_v56, %s1397_s3 }
 0x138   :  { %v357_v57 = vpop.f32.mrf.mxu3 }
 0x13a   :  { %v292_v58 = vpop.f32.mrf.mxu2 }
 0x13b   :  { %v1711_v59 = vadd.f32 %v357_v57, %v292_v58 }
 0x140   :  { %v1723_v50 = vpop.f32.mrf.mxu3 }
 0x1a8   :  { %v417_v62 = vpop.permute.xlu0 %416 }
 0x1a9   :  { %v419_v63 = vadd.f32 %v417_v62, %v340_v19 }
 0x1ab   :  { %1336 = vtanh.f32 %v419_v63 }
 0x1b1   :  { %v1337_v0 = vpop.eup %1336 }
 0x1b2   :  { %423 = vrot.lane.b32.xlu1 %v1337_v0, %s1398_s5 }
 0x224   :  { %v424_v4 = vpop.permute.xlu1 %423 }
 0x225   :  { %v426_v6 = vmul.f32 %v424_v4, %v421_v1 }
 0x227   :  { %v428_v7 = vadd.f32 %v427_v5, %v426_v6 }
 0x229   :  { %430 = vrot.lane.b32.xlu1 %v428_v7, %s1398_s5 }
 0x29b   :  { %v431_v10 = vpop.permute.xlu1 %430 }
 0x29c   :  { %433 = vst.msk [vmem:[#allocation2] sm:$0xff] %vm232_vm3, %v431_v10  ;;  %1278 = vmatmul.msk.f32.vlgmr.msrb.gmra.mxu1 %vm232_vm3, %v431_v10 }
 0x319   :  { %v453_v11 = vpop.f32.mrf.mxu1 }
 0x31a   :  { %477 = vrot.lane.b32.xlu2 %v453_v11, %s1397_s3  ;;  %v456_v13 = vadd.f32 %v453_v11, %v343_v12 }
 0x31c   :  { %v1279_v16 = vmul.f32 -1.442695, %v456_v13 }
 0x31e   :  { %1338 = vpow2.f32 %v1279_v16 }
 0x324   :  { %v1339_v17 = vpop.eup %1338 }
 0x325   :  { %v460_v18 = vadd.f32 1.0, %v1339_v17 }
 0x327   :  { %1340 = vrcp.f32 %v460_v18  ;;  %v472_v28 = vand.u32 2147483648, %v460_v18  ;;  %vm466_vm9 = vweird.f32 %v460_v18  ;;  %v470_v29 = vand.u32 2147483647, %v460_v18 }
 0x329   :  { %v473_v31 = vor.u32 1.1754944e-38, %v472_v28  ;;  %vm471_vm11 = vcmp.eq.f32.partialorder %v470_v29, 8.507059e+37  ;;  %v1733_v28 = vpop.f32.mrf.mxu2 }
 0x32d   :  { %v1341_v19 = vpop.eup %1340 }
 0x32e   :  { %v462_v20 = vmul.f32 %v1341_v19, %v460_v18  ;;  %vm467_vm8 = vweird.f32 %v1341_v19 }
 0x32f   :  { %vm468_vm10 = vmor %vm466_vm9, %vm467_vm8 }
 0x330   :  { %v463_v21 = vsub.f32 1.0, %v462_v20 }
 0x332   :  { %v464_v24 = vmul.f32 %v1341_v19, %v463_v21 }
 0x334   :  { %v465_v25 = vadd.f32 %v1341_v19, %v464_v24 }
 0x336   :  { %v469_v30 = vsel %vm468_vm10, %v1341_v19, %v465_v25 }
 0x337   :  { %v474_v23 = vsel %vm471_vm11, %v473_v31, %v469_v30 }
 0x338   :  { %v487_v40 = vsub.f32 1.0, %v474_v23  ;;  %v493_v44 = vmul.f32 %v474_v23, %v428_v7 }
 0x374   :  { %v478_v22 = vpop.permute.xlu2 %477 }
 0x375   :  { %v480_v33 = vmul.f32 %v478_v22, %v474_v23 }
 0x377   :  { %482 = vrot.lane.b32.xlu2 %v480_v33, %s1397_s3 }
 0x3d1   :  { %v483_v34 = vpop.permute.xlu2 %482 }
 0x3d2   :  { %v485_v35 = vadd.f32 %v483_v34, %v343_v12 }
 0x3d4   :  { %1342 = vtanh.f32 %v485_v35 }
 0x3da   :  { %v1343_v38 = vpop.eup %1342 }
 0x3db   :  { %489 = vrot.lane.b32.xlu0 %v1343_v38, %s1398_s5 }
 0x44d   :  { %v490_v41 = vpop.permute.xlu0 %489 }
 0x44e   :  { %v492_v45 = vmul.f32 %v490_v41, %v487_v40 }
 0x450   :  { %v494_v46 = vadd.f32 %v493_v44, %v492_v45 }
 0x452   :  { %496 = vrot.lane.b32.xlu1 %v494_v46, %s1398_s5 }
 0x4c4   :  { %v497_v47 = vpop.permute.xlu1 %496 }
 0x4c5   :  { %499 = vst.msk [vmem:[#allocation2 + $0x8] sm:$0xff] %vm232_vm3, %v497_v47  ;;  %1280 = vmatmul.msk.f32.vlgmr.msrb.gmra.mxu3 %vm232_vm3, %v497_v47 }
 0x4c6   :  { %1114 = vmatpush.msrb.mxu3 %v1073_v14 }
 0x548   :  { %v519_v52 = vpop.f32.mrf.mxu3 }
 0x549   :  { %543 = vrot.lane.b32.xlu2 %v519_v52, %s1397_s3  ;;  %v522_v56 = vadd.f32 %v519_v52, %v346_v53 }
 0x54b   :  { %v1281_v57 = vmul.f32 -1.442695, %v522_v56 }
 0x54d   :  { %1344 = vpow2.f32 %v1281_v57 }
 0x553   :  { %v1345_v58 = vpop.eup %1344 }
 0x554   :  { %v526_v62 = vadd.f32 1.0, %v1345_v58 }
 0x556   :  { %1346 = vrcp.f32 %v526_v62  ;;  %v538_v6 = vand.u32 2147483648, %v526_v62  ;;  %vm532_vm13 = vweird.f32 %v526_v62  ;;  %v536_v7 = vand.u32 2147483647, %v526_v62 }
 0x558   :  { %v539_v11 = vor.u32 1.1754944e-38, %v538_v6  ;;  %vm537_vm15 = vcmp.eq.f32.partialorder %v536_v7, 8.507059e+37 }
 0x55c   :  { %v1347_v63 = vpop.eup %1346 }
 0x55d   :  { %v528_v0 = vmul.f32 %v1347_v63, %v526_v62  ;;  %vm533_vm12 = vweird.f32 %v1347_v63 }
 0x55e   :  { %vm534_vm14 = vmor %vm532_vm13, %vm533_vm12 }
 0x55f   :  { %v529_v1 = vsub.f32 1.0, %v528_v0 }
 0x561   :  { %v530_v4 = vmul.f32 %v1347_v63, %v529_v1 }
 0x563   :  { %v531_v5 = vadd.f32 %v1347_v63, %v530_v4 }
 0x565   :  { %v535_v10 = vsel %vm534_vm14, %v1347_v63, %v531_v5 }
 0x566   :  { %v540_v27 = vsel %vm537_vm15, %v539_v11, %v535_v10 }
 0x567   :  { %v553_v18 = vsub.f32 1.0, %v540_v27  ;;  %v559_v20 = vmul.f32 %v540_v27, %v494_v46 }
 0x5a3   :  { %v544_v26 = vpop.permute.xlu2 %543 }
 0x5a4   :  { %v546_v12 = vmul.f32 %v544_v26, %v540_v27 }
 0x5a6   :  { %548 = vrot.lane.b32.xlu0 %v546_v12, %s1397_s3 }
 0x618   :  { %v549_v13 = vpop.permute.xlu0 %548 }
 0x619   :  { %v551_v16 = vadd.f32 %v549_v13, %v346_v53 }
 0x61b   :  { %1348 = vtanh.f32 %v551_v16 }
 0x621   :  { %v1349_v17 = vpop.eup %1348 }
 0x622   :  { %555 = vrot.lane.b32.xlu1 %v1349_v17, %s1398_s5 }
 0x694   :  { %v556_v19 = vpop.permute.xlu1 %555 }
 0x695   :  { %v558_v21 = vmul.f32 %v556_v19, %v553_v18 }
 0x697   :  { %v560_v24 = vadd.f32 %v559_v20, %v558_v21 }
 0x699   :  { %562 = vrot.lane.b32.xlu2 %v560_v24, %s1398_s5 }
 0x6f3   :  { %v563_v25 = vpop.permute.xlu2 %562 }
 0x6f4   :  { %565 = vst.msk [vmem:[#allocation2 + $0x10] sm:$0xff] %vm232_vm3, %v563_v25  ;;  %1282 = vmatmul.msk.f32.vlgmr.msrb.gmra.mxu2 %vm232_vm3, %v563_v25 }
 0x777   :  { %v585_v29 = vpop.f32.mrf.mxu2 }
 0x778   :  { %609 = vrot.lane.b32.xlu0 %v585_v29, %s1397_s3  ;;  %v588_v30 = vadd.f32 %v585_v29, %v1704_v32 }
 0x77a   :  { %v1283_v31 = vmul.f32 -1.442695, %v588_v30 }
 0x77c   :  { %1350 = vpow2.f32 %v1283_v31 }
 0x782   :  { %v1351_v22 = vpop.eup %1350 }
 0x783   :  { %v592_v23 = vadd.f32 1.0, %v1351_v22 }
 0x785   :  { %1352 = vrcp.f32 %v592_v23  ;;  %v604_v41 = vand.u32 2147483648, %v592_v23  ;;  %vm598_vm2 = vweird.f32 %v592_v23  ;;  %v602_v44 = vand.u32 2147483647, %v592_v23 }
 0x787   :  { %v605_v46 = vor.u32 1.1754944e-38, %v604_v41  ;;  %vm603_vm5 = vcmp.eq.f32.partialorder %v602_v44, 8.507059e+37  ;;  %v904_v41 = vld [vmem:[%s1961_s8] sm:$0xff] }
 0x78b   :  { %v1353_v33 = vpop.eup %1352 }
 0x78c   :  { %v594_v34 = vmul.f32 %v1353_v33, %v592_v23  ;;  %vm599_vm0 = vweird.f32 %v1353_v33 }
 0x78d   :  { %vm600_vm4 = vmor %vm598_vm2, %vm599_vm0 }
 0x78e   :  { %v595_v35 = vsub.f32 1.0, %v594_v34 }
 0x790   :  { %v596_v38 = vmul.f32 %v1353_v33, %v595_v35 }
 0x792   :  { %v597_v40 = vadd.f32 %v1353_v33, %v596_v38  ;;  %v907_v38 = vld [vmem:[%s1961_s8 + $0x18] sm:$0xff] }
 0x793   :  { %1021 = vmatpush.msrb.mxu1 %v907_v38 }
 0x794   :  { %v601_v45 = vsel %vm600_vm4, %v1353_v33, %v597_v40  ;;  %v906_v40 = vld [vmem:[%s1961_s8 + $0x10] sm:$0xff] }
 0x795   :  { %v606_v52 = vsel %vm603_vm5, %v605_v46, %v601_v45  ;;  %1022 = vmatpush.msrb.mxu1 %v906_v40  ;;  %v896_v45 = vld [vmem:[#allocation2] sm:$0xff]  ;;  %v897_v46 = vld [vmem:[#allocation2 + $0x8] sm:$0xff] }
 0x796   :  { %v619_v62 = vsub.f32 1.0, %v606_v52  ;;  %v625_v0 = vmul.f32 %v606_v52, %v560_v24 }
 0x7ea   :  { %v610_v47 = vpop.permute.xlu0 %609 }
 0x7eb   :  { %v612_v53 = vmul.f32 %v610_v47, %v606_v52  ;;  %v898_v47 = vld [vmem:[#allocation2 + $0x10] sm:$0xff] }
 0x7ed   :  { %614 = vrot.lane.b32.xlu1 %v612_v53, %s1397_s3 }
 0x85f   :  { %v615_v56 = vpop.permute.xlu1 %614 }
 0x860   :  { %v617_v57 = vadd.f32 %v615_v56, %v1704_v32 }
 0x862   :  { %1354 = vtanh.f32 %v617_v57 }
 0x868   :  { %v1355_v58 = vpop.eup %1354 }
 0x869   :  { %621 = vrot.lane.b32.xlu2 %v1355_v58, %s1398_s5 }
 0x8c3   :  { %v622_v63 = vpop.permute.xlu2 %621 }
 0x8c4   :  { %v624_v1 = vmul.f32 %v622_v63, %v619_v62 }
 0x8c6   :  { %v626_v4 = vadd.f32 %v625_v0, %v624_v1 }
 0x8c8   :  { %628 = vrot.lane.b32.xlu0 %v626_v4, %s1398_s5 }
 0x93a   :  { %v629_v5 = vpop.permute.xlu0 %628 }
 0x93b   :  { %631 = vst.msk [vmem:[#allocation2 + $0x18] sm:$0xff] %vm232_vm3, %v629_v5  ;;  %1284 = vmatmul.msk.f32.vlgmr.msra.gmra.mxu0 %vm232_vm3, %v629_v5 }
 0x942   :  { %v899_v52 = vld [vmem:[#allocation2 + $0x18] sm:$0xff] }
 0x9b8   :  { %v651_v6 = vpop.f32.mrf.mxu0 }
 0x9b9   :  { %675 = vrot.lane.b32.xlu1 %v651_v6, %s1397_s3  ;;  %v654_v32 = vadd.f32 %v651_v6, %v1706_v39 }
 0x9bb   :  { %v1285_v7 = vmul.f32 -1.442695, %v654_v32 }
 0x9bd   :  { %1356 = vpow2.f32 %v1285_v7 }
 0x9c3   :  { %v1357_v10 = vpop.eup %1356 }
 0x9c4   :  { %v658_v11 = vadd.f32 1.0, %v1357_v10 }
 0x9c6   :  { %1358 = vrcp.f32 %v658_v11  ;;  %v670_v17 = vand.u32 2147483648, %v658_v11  ;;  %vm664_vm7 = vweird.f32 %v658_v11  ;;  %v668_v18 = vand.u32 2147483647, %v658_v11 }
 0x9c8   :  { %v671_v20 = vor.u32 1.1754944e-38, %v670_v17  ;;  %vm669_vm9 = vcmp.eq.f32.partialorder %v668_v18, 8.507059e+37 }
 0x9cc   :  { %v1359_v26 = vpop.eup %1358 }
 0x9cd   :  { %v660_v27 = vmul.f32 %v1359_v26, %v658_v11  ;;  %vm665_vm6 = vweird.f32 %v1359_v26 }
 0x9ce   :  { %vm666_vm8 = vmor %vm664_vm7, %vm665_vm6 }
 0x9cf   :  { %v661_v12 = vsub.f32 1.0, %v660_v27 }
 0x9d1   :  { %v662_v13 = vmul.f32 %v1359_v26, %v661_v12 }
 0x9d3   :  { %v663_v16 = vadd.f32 %v1359_v26, %v662_v13 }
 0x9d5   :  { %v667_v19 = vsel %vm666_vm8, %v1359_v26, %v663_v16 }
 0x9d6   :  { %v672_v24 = vsel %vm669_vm9, %v671_v20, %v667_v19 }
 0x9d7   :  { %v685_v22 = vsub.f32 1.0, %v672_v24  ;;  %v691_v33 = vmul.f32 %v672_v24, %v626_v4 }
 0xa2b   :  { %v676_v21 = vpop.permute.xlu1 %675 }
 0xa2c   :  { %v678_v25 = vmul.f32 %v676_v21, %v672_v24 }
 0xa2e   :  { %680 = vrot.lane.b32.xlu2 %v678_v25, %s1397_s3 }
 0xa88   :  { %v681_v29 = vpop.permute.xlu2 %680 }
 0xa89   :  { %v683_v30 = vadd.f32 %v681_v29, %v1706_v39  ;;  %v905_v39 = vld [vmem:[%s1961_s8 + $0x8] sm:$0xff] }
 0xa8a   :  { %1023 = vmatpush.msrb.mxu1 %v905_v39 }
 0xa8b   :  { %1360 = vtanh.f32 %v683_v30 }
 0xa8c   :  { %1024 = vmatpush.msrb.mxu1 %v904_v41 }
 0xa91   :  { %v1361_v31 = vpop.eup %1360 }
 0xa92   :  { %687 = vrot.lane.b32.xlu0 %v1361_v31, %s1398_s5 }
 0xb04   :  { %v688_v23 = vpop.permute.xlu0 %687 }
 0xb05   :  { %v690_v34 = vmul.f32 %v688_v23, %v685_v22 }
 0xb07   :  { %v692_v35 = vadd.f32 %v691_v33, %v690_v34 }
 0xb09   :  { %694 = vrot.lane.b32.xlu1 %v692_v35, %s1398_s5 }
 0xb7b   :  { %v695_v44 = vpop.permute.xlu1 %694 }
 0xb7c   :  { %697 = vst.msk [vmem:[#allocation2 + $0x20] sm:$0xff] %vm232_vm3, %v695_v44  ;;  %1286 = vmatmul.msk.f32.vlgmr.msra.gmra.mxu1 %vm232_vm3, %v695_v44 }
 0xb83   :  { %v900_v53 = vld [vmem:[#allocation2 + $0x20] sm:$0xff] }
 0xb84   :  { %1300 = vmatmul.msk.f32.vlgmr.msrb.gmra.mxu1 %vm232_vm3, %v896_v45 }
 0xb8c   :  { %1301 = vmatmul.msk.f32.gmra.mxu1 %vm232_vm3, %v897_v46 }
 0xb94   :  { %1302 = vmatmul.msk.f32.gmra.mxu1 %vm232_vm3, %v898_v47 }
 0xb9c   :  { %1303 = vmatmul.msk.f32.gmra.mxu1 %vm232_vm3, %v899_v52 }
 0xba4   :  { %1304 = vmatmul.msk.f32.gmra.mxu1 %vm232_vm3, %v900_v53 }
 0xbf9   :  { %v717_v56 = vpop.f32.mrf.mxu1 }
 0xbfa   :  { %741 = vrot.lane.b32.xlu2 %v717_v56, %s1397_s3  ;;  %v720_v57 = vadd.f32 %v717_v56, %v1708_v51 }
 0xbfc   :  { %v1287_v58 = vmul.f32 -1.442695, %v720_v57 }
 0xbfe   :  { %1362 = vpow2.f32 %v1287_v58 }
 0xc04   :  { %v1363_v62 = vpop.eup %1362 }
 0xc05   :  { %v724_v63 = vadd.f32 1.0, %v1363_v62 }
 0xc07   :  { %1364 = vrcp.f32 %v724_v63  ;;  %v736_v32 = vand.u32 2147483648, %v724_v63  ;;  %vm730_vm11 = vweird.f32 %v724_v63  ;;  %v734_v7 = vand.u32 2147483647, %v724_v63 }
 0xc09   :  { %v737_v11 = vor.u32 1.1754944e-38, %v736_v32  ;;  %vm735_vm13 = vcmp.eq.f32.partialorder %v734_v7, 8.507059e+37  ;;  %v1830_v32 = vld [vmem:[%s1962_s9] ss:$0 sm:$0xff]  ;;  %v1026_v7 = vpop.f32.mrf.mxu1 }
 0xc0d   :  { %v1365_v0 = vpop.eup %1364 }
 0xc0e   :  { %v726_v1 = vmul.f32 %v1365_v0, %v724_v63  ;;  %vm731_vm10 = vweird.f32 %v1365_v0 }
 0xc0f   :  { %vm732_vm12 = vmor %vm730_vm11, %vm731_vm10 }
 0xc10   :  { %v727_v4 = vsub.f32 1.0, %v726_v1 }
 0xc12   :  { %v728_v5 = vmul.f32 %v1365_v0, %v727_v4  ;;  %v1071_v4 = vld [vmem:[%s1963_s10 + $0x8] sm:$0xff] }
 0xc14   :  { %v729_v6 = vadd.f32 %v1365_v0, %v728_v5  ;;  %v1070_v5 = vld [vmem:[%s1963_s10] sm:$0xff] }
 0xc16   :  { %v733_v10 = vsel %vm732_vm12, %v1365_v0, %v729_v6 }
 0xc17   :  { %v738_v27 = vsel %vm735_vm13, %v737_v11, %v733_v10 }
 0xc18   :  { %v751_v18 = vsub.f32 1.0, %v738_v27  ;;  %v757_v20 = vmul.f32 %v738_v27, %v692_v35 }
 0xc54   :  { %v742_v26 = vpop.permute.xlu2 %741 }
 0xc55   :  { %v744_v12 = vmul.f32 %v742_v26, %v738_v27 }
 0xc57   :  { %746 = vrot.lane.b32.xlu0 %v744_v12, %s1397_s3  ;;  %v361_v12 = vadd.f32 %v1723_v50, %v1733_v28 }
 0xcc9   :  { %v747_v13 = vpop.permute.xlu0 %746 }
 0xcca   :  { %v749_v16 = vadd.f32 %v747_v13, %v1708_v51 }
 0xccc   :  { %1366 = vtanh.f32 %v749_v16 }
 0xcd2   :  { %v1367_v17 = vpop.eup %1366 }
 0xcd3   :  { %753 = vrot.lane.b32.xlu1 %v1367_v17, %s1398_s5 }
 0xd45   :  { %v754_v19 = vpop.permute.xlu1 %753 }
 0xd46   :  { %v756_v21 = vmul.f32 %v754_v19, %v751_v18 }
 0xd48   :  { %v758_v24 = vadd.f32 %v757_v20, %v756_v21 }
 0xd4a   :  { %760 = vrot.lane.b32.xlu2 %v758_v24, %s1398_s5 }
 0xda4   :  { %v761_v25 = vpop.permute.xlu2 %760 }
 0xda5   :  { %763 = vst.msk [vmem:[#allocation2 + $0x28] sm:$0xff] %vm232_vm3, %v761_v25  ;;  %1288 = vmatmul.msk.f32.vlgmr.msra.gmra.mxu3 %vm232_vm3, %v761_v25 }
 0xdac   :  { %v901_v29 = vld [vmem:[#allocation2 + $0x28] sm:$0xff] }
 0xdad   :  { %1305 = vmatmul.msk.f32.gmra.mxu1 %vm232_vm3, %v901_v29  ;;  %v1153_v29 = vld [vmem:[%s1965_s12 + $0x10] sm:$0xff] }
 0xe28   :  { %v783_v51 = vpop.f32.mrf.mxu3 }
 0xe29   :  { %807 = vrot.lane.b32.xlu0 %v783_v51, %s1397_s3  ;;  %v786_v30 = vadd.f32 %v783_v51, %v1711_v59  ;;  %v1152_v51 = vld [vmem:[%s1965_s12 + $0x8] sm:$0xff] }
 0xe2b   :  { %v1289_v31 = vmul.f32 -1.442695, %v786_v30 }
 0xe2d   :  { %1368 = vpow2.f32 %v1289_v31  ;;  %v1151_v31 = vld [vmem:[%s1965_s12] sm:$0xff] }
 0xe33   :  { %v1369_v22 = vpop.eup %1368 }
 0xe34   :  { %v790_v23 = vadd.f32 1.0, %v1369_v22 }
 0xe36   :  { %1370 = vrcp.f32 %v790_v23  ;;  %v802_v39 = vand.u32 2147483648, %v790_v23  ;;  %vm796_vm15 = vweird.f32 %v790_v23  ;;  %v800_v41 = vand.u32 2147483647, %v790_v23 }
 0xe38   :  { %v803_v45 = vor.u32 1.1754944e-38, %v802_v39  ;;  %vm801_vm2 = vcmp.eq.f32.partialorder %v800_v41, 8.507059e+37 }
 0xe3c   :  { %v1371_v33 = vpop.eup %1370 }
 0xe3d   :  { %v792_v34 = vmul.f32 %v1371_v33, %v790_v23  ;;  %vm797_vm14 = vweird.f32 %v1371_v33 }
 0xe3e   :  { %vm798_vm0 = vmor %vm796_vm15, %vm797_vm14 }
 0xe3f   :  { %v793_v35 = vsub.f32 1.0, %v792_v34 }
 0xe41   :  { %v794_v38 = vmul.f32 %v1371_v33, %v793_v35 }
 0xe43   :  { %v795_v40 = vadd.f32 %v1371_v33, %v794_v38  ;;  %v1858_v38 = vld [vmem:[%s1964_s11] ss:$0 sm:$0xff] }
 0xe45   :  { %v799_v44 = vsel %vm798_vm0, %v1371_v33, %v795_v40 }
 0xe46   :  { %v804_v47 = vsel %vm801_vm2, %v803_v45, %v799_v44 }
 0xe47   :  { %v817_v58 = vsub.f32 1.0, %v804_v47  ;;  %v823_v63 = vmul.f32 %v804_v47, %v758_v24  ;;  %v1154_v24 = vld [vmem:[%s1965_s12 + $0x18] sm:$0xff] }
 0xe48   :  { %1195 = vmatpush.msrb.mxu2 %v1154_v24 }
 0xe4a   :  { %1196 = vmatpush.msrb.mxu2 %v1153_v29 }
 0xe4c   :  { %1197 = vmatpush.msrb.mxu2 %v1152_v51 }
 0xe4e   :  { %1198 = vmatpush.msrb.mxu2 %v1151_v31 }
 0xe9b   :  { %v808_v46 = vpop.permute.xlu0 %807 }
 0xe9c   :  { %v810_v52 = vmul.f32 %v808_v46, %v804_v47 }
 0xe9e   :  { %812 = vrot.lane.b32.xlu1 %v810_v52, %s1397_s3 }
 0xf10   :  { %v813_v53 = vpop.permute.xlu1 %812 }
 0xf11   :  { %v815_v56 = vadd.f32 %v813_v53, %v1711_v59  ;;  %v911_v59 = vld [vmem:[%s1961_s8 + $0x38] sm:$0xff] }
 0xf12   :  { %956 = vmatpush.msrb.mxu0 %v911_v59 }
 0xf13   :  { %1372 = vtanh.f32 %v815_v56  ;;  %v1029_v56 = vpop.f32.mrf.mxu1 }
 0xf14   :  { %957 = vmatpush.msrb.mxu0 %v910_v36 }
 0xf19   :  { %v1373_v57 = vpop.eup %1372 }
 0xf1a   :  { %819 = vrot.lane.b32.xlu2 %v1373_v57, %s1398_s5 }
 0xf1b   :  { %v1032_v36 = vpop.f32.mrf.mxu1 }
 0xf74   :  { %v820_v62 = vpop.permute.xlu2 %819 }
 0xf75   :  { %v822_v0 = vmul.f32 %v820_v62, %v817_v58 }
 0xf77   :  { %v1782_v1 = vadd.f32 %v823_v63, %v822_v0 }
 0xf79   :  { %826 = vrot.lane.b32.xlu0 %v1782_v1, %s1398_s5 }
 0xf81   :  { %912 = vrot.lane.b32.xlu0 %v218_v37, %s1398_s5  ;;  %v909_v37 = vld [vmem:[%s1961_s8 + $0x28] sm:$0xff] }
 0xf82   :  { %958 = vmatpush.msrb.mxu0 %v909_v37 }
 0xf84   :  { %959 = vmatpush.msrb.mxu0 %v908_v48 }
 0xf89   :  { %916 = vrot.lane.b32.xlu0 %v220_v49, %s1398_s5 }
 0xf91   :  { %922 = vrot.lane.b32.xlu0 %v223_v3, %s1398_s5 }
 0xf99   :  { %926 = vrot.lane.b32.xlu0 %v225_v15, %s1398_s5  ;;  %v1072_v15 = vld [vmem:[%s1963_s10 + $0x10] sm:$0xff] }
 0xf9a   :  { %1115 = vmatpush.msrb.mxu3 %v1072_v15 }
 0xf9c   :  { %1116 = vmatpush.msrb.mxu3 %v1071_v4 }
 0xf9e   :  { %1117 = vmatpush.msrb.mxu3 %v1070_v5  ;;  %v1035_v5 = vpop.f32.mrf.mxu1 }
 0xfeb   :  { %v827_v49 = vpop.permute.xlu0 %826 }
 0xfec   :  { %829 = vst.msk [vmem:[#allocation2 + $0x30] sm:$0xff] %vm232_vm3, %v827_v49  ;;  %1290 = vmatmul.msk.f32.vlgmr.msra.gmra.mxu2 %vm232_vm3, %v827_v49 }
 0xff3   :  { %v913_v2 = vpop.permute.xlu0 %912  ;;  %v902_v3 = vld [vmem:[#allocation2 + $0x30] sm:$0xff] }
 0xff4   :  { %1292 = vmatmul.msk.f32.vlgmr.msrb.gmra.mxu0 %vm232_vm3, %v913_v2  ;;  %1306 = vmatmul.msk.f32.gmra.mxu1 %vm232_vm3, %v902_v3 }
 0xffb   :  { %v917_v44 = vpop.permute.xlu0 %916 }
0x1003   :  { %v923_v2 = vpop.permute.xlu0 %922 }
0x100b   :  { %v927_v14 = vpop.permute.xlu0 %926 }
0x106f   :  { %v849_v6 = vpop.f32.mrf.mxu2 }
0x1070   :  { %873 = vrot.lane.b32.xlu1 %v849_v6, %s1397_s3  ;;  %v852_v13 = vadd.f32 %v849_v6, %v361_v12 }
0x1071   :  { %v961_v10 = vpop.f32.mrf.mxu0 }
0x1072   :  { %v1027_v11 = vadd.f32 %v1026_v7, %v961_v10  ;;  %v1291_v16 = vmul.f32 -1.442695, %v852_v13 }
0x1074   :  { %v1054_v26 = vadd.f32 %v1830_v32, %v1027_v11  ;;  %1374 = vpow2.f32 %v1291_v16 }
0x1076   :  { %v1062_v27 = vmax.f32 %v1054_v26, 0.0  ;;  %v1038_v26 = vpop.f32.mrf.mxu1 }
0x1078   :  { %1308 = vmatmul.msk.f32.vlgmr.msrb.gmra.mxu3 %vm232_vm3, %v1062_v27 }
0x107a   :  { %v1375_v17 = vpop.eup %1374 }
0x107b   :  { %v856_v18 = vadd.f32 1.0, %v1375_v17 }
0x107d   :  { %1376 = vrcp.f32 %v856_v18  ;;  %v868_v28 = vand.u32 2147483648, %v856_v18  ;;  %vm862_vm5 = vweird.f32 %v856_v18  ;;  %v866_v30 = vand.u32 2147483647, %v856_v18 }
0x107f   :  { %v869_v23 = vor.u32 1.1754944e-38, %v868_v28  ;;  %vm867_vm7 = vcmp.eq.f32.partialorder %v866_v30, 8.507059e+37 }
0x1083   :  { %v1377_v19 = vpop.eup %1376 }
0x1084   :  { %v858_v20 = vmul.f32 %v1377_v19, %v856_v18  ;;  %vm863_vm4 = vweird.f32 %v1377_v19 }
0x1085   :  { %vm864_vm6 = vmor %vm862_vm5, %vm863_vm4 }
0x1086   :  { %v859_v21 = vsub.f32 1.0, %v858_v20 }
0x1088   :  { %v860_v25 = vmul.f32 %v1377_v19, %v859_v21 }
0x108a   :  { %v861_v50 = vadd.f32 %v1377_v19, %v860_v25 }
0x108c   :  { %v865_v22 = vsel %vm864_vm6, %v1377_v19, %v861_v50  ;;  %v1041_v19 = vpop.f32.mrf.mxu1 }
0x108d   :  { %v870_v34 = vsel %vm867_vm7, %v869_v23, %v865_v22 }
0x108e   :  { %v883_v47 = vsub.f32 1.0, %v870_v34  ;;  %v889_v54 = vmul.f32 %v870_v34, %v1782_v1 }
0x1094   :  { %v1044_v51 = vpop.f32.mrf.mxu1 }
0x10e2   :  { %v874_v33 = vpop.permute.xlu1 %873 }
0x10e3   :  { %v876_v35 = vmul.f32 %v874_v33, %v870_v34 }
0x10e5   :  { %878 = vrot.lane.b32.xlu2 %v876_v35, %s1397_s3 }
0x10ed   :  { %914 = vrot.lane.b32.xlu2 %v219_v43, %s1398_s5 }
0x10f5   :  { %920 = vrot.lane.b32.xlu2 %v222_v61, %s1398_s5 }
0x10fb   :  { %v1119_v40 = vpop.f32.mrf.mxu3 }
0x10fc   :  { %v1120_v39 = vadd.f32 %v1858_v38, %v1119_v40 }
0x10fd   :  { %924 = vrot.lane.b32.xlu2 %v224_v9, %s1398_s5 }
0x10fe   :  { %v1143_v41 = vmax.f32 %v1120_v39, 0.0 }
0x1100   :  { %1316 = vmatmul.msk.f32.vlgmr.msrb.gmra.mxu2 %vm232_vm3, %v1143_v41 }
0x113f   :  { %v879_v42 = vpop.permute.xlu2 %878 }
0x1140   :  { %v881_v43 = vadd.f32 %v879_v42, %v361_v12 }
0x1142   :  { %1378 = vtanh.f32 %v881_v43 }
0x1147   :  { %v915_v60 = vpop.permute.xlu2 %914 }
0x1148   :  { %v1379_v61 = vpop.eup %1378  ;;  %1293 = vmatmul.msk.f32.gmra.mxu0 %vm232_vm3, %v915_v60 }
0x1149   :  { %885 = vrot.lane.b32.xlu1 %v1379_v61, %s1398_s5 }
0x114f   :  { %v921_v59 = vpop.permute.xlu2 %920 }
0x1150   :  { %1294 = vmatmul.msk.f32.gmra.mxu0 %vm232_vm3, %v917_v44 }
0x1151   :  { %918 = vrot.lane.b32.xlu1 %v221_v55, %s1398_s5 }
0x1157   :  { %v925_v3 = vpop.permute.xlu2 %924 }
0x1183   :  { %v1200_v9 = vpop.f32.mrf.mxu2 }
0x1184   :  { %v1201_v45 = vadd.f32 %v1874_v8, %v1200_v9 }
0x1186   :  { %1380 = vtanh.f32 %v1201_v45 }
0x118c   :  { %v1381_v46 = vpop.eup %1380 }
0x118d   :  { %1232 = vst.msk [vmem:[%s1967_s14] sm:$0xff] %vm68_vm1, %v1381_v46 }
0x11bb   :  { %v886_v52 = vpop.permute.xlu1 %885 }
0x11bc   :  { %v888_v55 = vmul.f32 %v886_v52, %v883_v47 }
0x11be   :  { %v890_v53 = vadd.f32 %v889_v54, %v888_v55 }
0x11c0   :  { %892 = vrot.lane.b32.xlu1 %v890_v53, %s1398_s5 }
0x11c3   :  { %v919_v57 = vpop.permute.xlu1 %918 }
0x11c4   :  { %1295 = vmatmul.msk.f32.gmra.mxu0 %vm232_vm3, %v919_v57 }
0x11c5   :  { %v964_v58 = vpop.f32.mrf.mxu0 }
0x11c6   :  { %v1030_v62 = vadd.f32 %v1029_v56, %v964_v58 }
0x11c8   :  { %v1055_v63 = vadd.f32 %v1830_v32, %v1030_v62 }
0x11ca   :  { %v1063_v0 = vmax.f32 %v1055_v63, 0.0 }
0x11cc   :  { %1296 = vmatmul.msk.f32.gmra.mxu0 %vm232_vm3, %v921_v59  ;;  %1309 = vmatmul.msk.f32.gmra.mxu3 %vm232_vm3, %v1063_v0 }
0x11cd   :  { %v967_v1 = vpop.f32.mrf.mxu0 }
0x11ce   :  { %v1033_v37 = vadd.f32 %v1032_v36, %v967_v1 }
0x11d0   :  { %v1056_v48 = vadd.f32 %v1830_v32, %v1033_v37 }
0x11d2   :  { %v1064_v49 = vmax.f32 %v1056_v48, 0.0 }
0x11d4   :  { %1297 = vmatmul.msk.f32.gmra.mxu0 %vm232_vm3, %v923_v2  ;;  %1310 = vmatmul.msk.f32.gmra.mxu3 %vm232_vm3, %v1064_v49 }
0x11dc   :  { %1298 = vmatmul.msk.f32.gmra.mxu0 %vm232_vm3, %v925_v3 }
0x11e4   :  { %1299 = vmatmul.msk.f32.gmra.mxu0 %vm232_vm3, %v927_v14 }
0x1232   :  { %v893_v15 = vpop.permute.xlu1 %892 }
0x1233   :  { %895 = vst.msk [vmem:[#allocation2 + $0x38] sm:$0xff] %vm232_vm3, %v893_v15 }
0x123a   :  { %v903_v4 = vld [vmem:[#allocation2 + $0x38] sm:$0xff] }
0x123b   :  { %1307 = vmatmul.msk.f32.gmra.mxu1 %vm232_vm3, %v903_v4 }
0x1241   :  { %v970_v6 = vpop.f32.mrf.mxu0 }
0x1242   :  { %v1036_v7 = vadd.f32 %v1035_v5, %v970_v6 }
0x1244   :  { %v1057_v10 = vadd.f32 %v1830_v32, %v1036_v7 }
0x1246   :  { %v1065_v11 = vmax.f32 %v1057_v10, 0.0 }
0x1248   :  { %1311 = vmatmul.msk.f32.gmra.mxu3 %vm232_vm3, %v1065_v11 }
0x1249   :  { %v973_v27 = vpop.f32.mrf.mxu0 }
0x124a   :  { %v1039_v12 = vadd.f32 %v1038_v26, %v973_v27 }
0x124c   :  { %v1058_v13 = vadd.f32 %v1830_v32, %v1039_v12 }
0x124e   :  { %v1066_v16 = vmax.f32 %v1058_v13, 0.0 }
0x124f   :  { %v1122_v17 = vpop.f32.mrf.mxu3 }
0x1250   :  { %v1123_v18 = vadd.f32 %v1858_v38, %v1122_v17  ;;  %1312 = vmatmul.msk.f32.gmra.mxu3 %vm232_vm3, %v1066_v16 }
0x1251   :  { %v976_v20 = vpop.f32.mrf.mxu0 }
0x1252   :  { %v1144_v21 = vmax.f32 %v1123_v18, 0.0  ;;  %v1042_v24 = vadd.f32 %v1041_v19, %v976_v20 }
0x1254   :  { %v1059_v25 = vadd.f32 %v1830_v32, %v1042_v24  ;;  %1317 = vmatmul.msk.f32.gmra.mxu2 %vm232_vm3, %v1144_v21 }
0x1256   :  { %v1067_v29 = vmax.f32 %v1059_v25, 0.0 }
0x1257   :  { %v1125_v50 = vpop.f32.mrf.mxu3 }
0x1258   :  { %v1126_v28 = vadd.f32 %v1858_v38, %v1125_v50  ;;  %1313 = vmatmul.msk.f32.gmra.mxu3 %vm232_vm3, %v1067_v29 }
0x1259   :  { %v979_v30 = vpop.f32.mrf.mxu0 }
0x125a   :  { %v1145_v31 = vmax.f32 %v1126_v28, 0.0  ;;  %v1045_v22 = vadd.f32 %v1044_v51, %v979_v30 }
0x125c   :  { %v1060_v23 = vadd.f32 %v1830_v32, %v1045_v22  ;;  %1318 = vmatmul.msk.f32.gmra.mxu2 %vm232_vm3, %v1145_v31 }
0x125e   :  { %v1068_v33 = vmax.f32 %v1060_v23, 0.0 }
0x1260   :  { %1314 = vmatmul.msk.f32.gmra.mxu3 %vm232_vm3, %v1068_v33 }
0x1261   :  { %v982_v34 = vpop.f32.mrf.mxu0 }
0x12b8   :  { %v1047_v35 = vpop.f32.mrf.mxu1 }
0x12b9   :  { %v1048_v40 = vadd.f32 %v1047_v35, %v982_v34 }
0x12bb   :  { %v1061_v39 = vadd.f32 %v1830_v32, %v1048_v40 }
0x12bd   :  { %v1069_v41 = vmax.f32 %v1061_v39, 0.0 }
0x12bf   :  { %1315 = vmatmul.msk.f32.gmra.mxu3 %vm232_vm3, %v1069_v41 }
0x12cb   :  { %v1128_v42 = vpop.f32.mrf.mxu3 }
0x12cc   :  { %v1129_v43 = vadd.f32 %v1858_v38, %v1128_v42 }
0x12ce   :  { %v1146_v60 = vmax.f32 %v1129_v43, 0.0 }
0x12d0   :  { %1319 = vmatmul.msk.f32.gmra.mxu2 %vm232_vm3, %v1146_v60 }
0x12d3   :  { %v1131_v61 = vpop.f32.mrf.mxu3 }
0x12d4   :  { %v1132_v44 = vadd.f32 %v1858_v38, %v1131_v61 }
0x12d6   :  { %v1147_v9 = vmax.f32 %v1132_v44, 0.0 }
0x12d7   :  { %v1203_v45 = vpop.f32.mrf.mxu2 }
0x12d8   :  { %v1204_v46 = vadd.f32 %v1874_v8, %v1203_v45  ;;  %1320 = vmatmul.msk.f32.gmra.mxu2 %vm232_vm3, %v1147_v9 }
0x12da   :  { %1382 = vtanh.f32 %v1204_v46 }
0x12db   :  { %v1134_v32 = vpop.f32.mrf.mxu3 }
0x12dc   :  { %v1135_v47 = vadd.f32 %v1858_v38, %v1134_v32 }
0x12de   :  { %v1148_v52 = vmax.f32 %v1135_v47, 0.0 }
0x12df   :  { %v1206_v54 = vpop.f32.mrf.mxu2 }
0x12e0   :  { %v1383_v55 = vpop.eup %1382  ;;  %v1207_v53 = vadd.f32 %v1874_v8, %v1206_v54  ;;  %1321 = vmatmul.msk.f32.gmra.mxu2 %vm232_vm3, %v1148_v52 }
0x12e1   :  { %1233 = vst.msk [vmem:[%s1967_s14 + $0x8] sm:$0xff] %vm68_vm1, %v1383_v55 }
0x12e2   :  { %1384 = vtanh.f32 %v1207_v53 }
0x12e3   :  { %v1137_v56 = vpop.f32.mrf.mxu3 }
0x12e4   :  { %v1138_v57 = vadd.f32 %v1858_v38, %v1137_v56 }
0x12e6   :  { %v1149_v58 = vmax.f32 %v1138_v57, 0.0 }
0x12e8   :  { %v1385_v62 = vpop.eup %1384  ;;  %1322 = vmatmul.msk.f32.gmra.mxu2 %vm232_vm3, %v1149_v58 }
0x12e9   :  { %1234 = vst.msk [vmem:[%s1967_s14 + $0x10] sm:$0xff] %vm68_vm1, %v1385_v62 }
0x1342   :  { %v1140_v63 = vpop.f32.mrf.mxu3 }
0x1343   :  { %v1141_v0 = vadd.f32 %v1858_v38, %v1140_v63 }
0x1345   :  { %v1150_v59 = vmax.f32 %v1141_v0, 0.0 }
0x1347   :  { %1323 = vmatmul.msk.f32.gmra.mxu2 %vm232_vm3, %v1150_v59 }
0x1353   :  { %v1209_v36 = vpop.f32.mrf.mxu2 }
0x1354   :  { %v1210_v1 = vadd.f32 %v1874_v8, %v1209_v36 }
0x1356   :  { %1386 = vtanh.f32 %v1210_v1 }
0x135b   :  { %v1212_v37 = vpop.f32.mrf.mxu2 }
0x135c   :  { %v1387_v48 = vpop.eup %1386  ;;  %v1213_v49 = vadd.f32 %v1874_v8, %v1212_v37 }
0x135d   :  { %1235 = vst.msk [vmem:[%s1967_s14 + $0x18] sm:$0xff] %vm68_vm1, %v1387_v48 }
0x135e   :  { %1388 = vtanh.f32 %v1213_v49 }
0x1363   :  { %v1215_v2 = vpop.f32.mrf.mxu2 }
0x1364   :  { %v1389_v3 = vpop.eup %1388  ;;  %v1216_v38 = vadd.f32 %v1874_v8, %v1215_v2 }
0x1365   :  { %1236 = vst.msk [vmem:[%s1967_s14 + $0x20] sm:$0xff] %vm68_vm1, %v1389_v3 }
0x1366   :  { %1390 = vtanh.f32 %v1216_v38 }
0x136b   :  { %v1218_v14 = vpop.f32.mrf.mxu2 }
0x136c   :  { %v1391_v15 = vpop.eup %1390  ;;  %v1219_v4 = vadd.f32 %v1874_v8, %v1218_v14 }
0x136d   :  { %1237 = vst.msk [vmem:[%s1967_s14 + $0x28] sm:$0xff] %vm68_vm1, %v1391_v15 }
0x136e   :  { %1392 = vtanh.f32 %v1219_v4 }
0x1374   :  { %v1393_v5 = vpop.eup %1392 }
0x1375   :  { %1238 = vst.msk [vmem:[%s1967_s14 + $0x30] sm:$0xff] %vm68_vm1, %v1393_v5 }
0x13ca   :  { %v1221_v6 = vpop.f32.mrf.mxu2 }
0x13cb   :  { %v1222_v7 = vadd.f32 %v1874_v8, %v1221_v6 }
0x13cd   :  { %1394 = vtanh.f32 %v1222_v7 }
0x13d3   :  { %v1395_v10 = vpop.eup %1394 }
0x13d4   :  { %1239 = vst.msk [vmem:[%s1967_s14 + $0x38] sm:$0xff] %vm68_vm1, %v1395_v10 }

</bundles_post_ra>
